<compile_context>
chip_gen: v7x
topology: tpu7x:2x2x1
jax: 0.10.0
libtpu: 0.0.40
codegen_flags: <defaults>
</compile_context>

<pallas_src>
import functools

import jax
import jax.numpy as jnp
from jax.experimental import pallas as pl
from jax.experimental.pallas import tpu as pltpu

NEG_INF = -1e12
F32 = jnp.float32
BF16 = jnp.bfloat16
LANE = 128
SUB16 = 16          # bf16 sublane tile height


def _round_up(x, m):
    return ((x + m - 1) // m) * m


def _pad_lanes(x, width):
    pad = width - x.shape[-1]
    if pad == 0:
        return x
    return jnp.concatenate([x, jnp.zeros(x.shape[:-1] + (pad,), x.dtype)], axis=-1)


# ----------------------------------------------------------------------------- kernel
def _prediction_kernel(data_ref, enc_ref, var_ref, gate_ref, attn_ref, score_ref, out_ref,
                       *, Hd, He, E, S1p, S2p, Ocp,
                       off_hl, off_src, off_cand, w_sc, w_nd, w_cx):
    BB = data_ref.shape[0]
    Nc = Ocp + S2p

    data = data_ref[...]                                         # (BB, D) f32, 128-aligned sections
    lc16 = data[:, :2 * Hd].astype(BF16)                         # cat(left, cur)
    has_left = data[:, off_hl:off_hl + 1]                        # (BB, 1)
    src_bias = data[:, off_src:off_src + S1p]                    # additive (0 / -1e12)
    cand_bias = data[:, off_cand:off_cand + Nc]                  # additive (+vsb folded, -1e12 masks)

    # --- gated node embedding: r/rg branch on [left|cur], l/lg branch on cur only ------
    zr = (jnp.dot(lc16, gate_ref[:2 * Hd, :], preferred_element_type=F32)
          + gate_ref[3 * Hd, :].astype(F32))                     # (BB, 2Hd)
    zl = (jnp.dot(lc16[:, Hd:], gate_ref[2 * Hd:3 * Hd, :], preferred_element_type=F32)
          + gate_ref[3 * Hd + 1, :].astype(F32))                 # (BB, 2Hd)
    node_r = jnp.tanh(zr[:, :Hd]) * jax.nn.sigmoid(zr[:, Hd:])
    node_l = jnp.tanh(zl[:, :Hd]) * jax.nn.sigmoid(zl[:, Hd:])
    node = jnp.where(has_left > 0, node_r, node_l)               # (BB, Hd) f32
    node16 = node.astype(BF16)

    # --- attention over encoder outputs -------------------------------------------------
    enc = enc_ref[...]                                           # (BB, S1p, He) bf16
    enc_proj = jnp.dot(enc.reshape(BB * S1p, He), attn_ref[Hd:Hd + He, :],
                       preferred_element_type=F32).reshape(BB, S1p, Hd)
    node_proj = (jnp.dot(node16, attn_ref[:Hd, :], preferred_element_type=F32)
                 + attn_ref[Hd + He, :].astype(F32))             # (BB, Hd)
    energy = jnp.tanh(enc_proj + node_proj[:, None, :])          # (BB, S1p, Hd) f32
    # NOTE: attn score bias is a constant added to every pre-softmax logit -> cancels.
    att = jnp.sum(energy * attn_ref[Hd + He + 1, :], axis=-1) + src_bias       # (BB, S1p)
    m = jnp.max(att, axis=-1, keepdims=True)
    ex = jnp.exp(att - m)
    attw = ex * pl.reciprocal(jnp.sum(ex, axis=-1, keepdims=True), approx=True)
    ctx = jnp.einsum("bqs,bse->bqe", attw.astype(BF16)[:, None, :], enc,
                     preferred_element_type=F32)[:, 0, :]        # (BB, He) f32
    ctx16 = ctx.astype(BF16)

    # --- candidate scoring (op/const projection precomputed per model) ------------------
    wsn = score_ref[:Hd, :]
    wsc = score_ref[Hd:Hd + He, :]
    wse = score_ref[Hd + He:Hd + He + E, :]
    op_proj = score_ref[Hd + He + E:Hd + He + E + Ocp, :].astype(F32)   # (Ocp, E), hoisted
    bsc = score_ref[Hd + He + E + Ocp, :].astype(F32)
    vs = score_ref[Hd + He + E + Ocp + 1, :]

    leaf = (jnp.dot(node16, wsn, preferred_element_type=F32)
            + jnp.dot(ctx16, wsc, preferred_element_type=F32) + bsc)        # (BB, E)
    var_proj = jnp.dot(var_ref[...].reshape(BB * S2p, E), wse,
                       preferred_element_type=F32).reshape(BB, S2p, E)
    sc_op = jnp.sum(jnp.tanh(op_proj[None, :, :] + leaf[:, None, :]) * vs, axis=-1)   # (BB, Ocp)
    sc_var = jnp.sum(jnp.tanh(var_proj + leaf[:, None, :]) * vs, axis=-1)             # (BB, S2p)
    scores = jnp.concatenate([sc_op, sc_var], axis=-1) + cand_bias                    # (BB, Nc)

    # --- three 128-lane-aligned unmasked stores: [scores | node | ctx] -------------------
    out_ref[:, :w_sc] = _pad_lanes(scores, w_sc)
    out_ref[:, w_sc:w_sc + w_nd] = _pad_lanes(node, w_nd)
    out_ref[:, w_sc + w_nd:w_sc + w_nd + w_cx] = _pad_lanes(ctx, w_cx)


# ----------------------------------------------------------------------------- weight packing (once per model)
def pack_prediction_params(params):
    """Pack Prediction weights into 3 lane-dense bf16 slabs. Call ONCE per model."""
    Hd = params["concat_l_w"].shape[0]
    He = params["attn_attn_w"].shape[1] - Hd
    E = params["score_attn_w"].shape[0]
    Oc = params["embedding_op_const"].shape[0]
    Ocp = _round_up(Oc, 8)

    # gate slab: [W_r (2Hd) | W_l (Hd) | b_r | b_l] x 2Hd cols (matrices first -> aligned rows)
    W_r = jnp.concatenate([params["concat_r_w"].T, params["concat_rg_w"].T], axis=1)   # (2Hd, 2Hd)
    W_l = jnp.concatenate([params["concat_l_w"].T, params["concat_lg_w"].T], axis=1)   # (Hd, 2Hd)
    b_r = jnp.concatenate([params["concat_r_b"], params["concat_rg_b"]])[None, :]
    b_l = jnp.concatenate([params["concat_l_b"], params["concat_lg_b"]])[None, :]
    gate_slab = jnp.concatenate([W_r, W_l, b_r, b_l], axis=0).astype(BF16)             # (3Hd+2, 2Hd)

    # attn slab: [wad (Hd) | wae (He) | ba | va] x Hd cols; attn_score_b cancels in softmax.
    wa = params["attn_attn_w"]                                                          # (Hd, Hd+He)
    attn_slab = jnp.concatenate([wa[:, :Hd].T, wa[:, Hd:].T,
                                 params["attn_attn_b"][None, :],
                                 params["attn_score_w"]], axis=0).astype(BF16)          # (Hd+He+2, Hd)

    # score slab: [wsn | wsc | wse | op_proj (hoisted) | bsc | vs] x E cols
    ws = params["score_attn_w"]                                                         # (E, Hd+He+E)
    wse = ws[:, Hd + He:].T                                                             # (E, E)
    op_proj = jnp.dot(params["embedding_op_const"].astype(F32), wse.astype(F32))        # (Oc, E)
    op_proj = jnp.pad(op_proj, ((0, Ocp - Oc), (0, 0)))
    score_slab = jnp.concatenate([ws[:, :Hd].T, ws[:, Hd:Hd + He].T, wse, op_proj,
                                  params["score_attn_b"][None, :],
                                  params["score_score_w"]], axis=0).astype(BF16)        # (Hd+He+E+Ocp+2, E)

    return dict(gate_slab=gate_slab, attn_slab=attn_slab, score_slab=score_slab,
                vsb=params["score_score_b"].astype(F32).reshape(()),
                op_const=params["embedding_op_const"].astype(F32),
                Hd=Hd, He=He, E=E, Oc=Oc, Ocp=Ocp)


# ----------------------------------------------------------------------------- wrapper (per decode step)
def prediction_forward(packed, cur_emb, left_emb, has_left,
                       encoder_outputs, var_pades, source_mask, candi_mask, *, block_b=64):
    Hd, He, E = packed["Hd"], packed["He"], packed["E"]
    Oc, Ocp = packed["Oc"], packed["Ocp"]
    B, S1, _ = encoder_outputs.shape
    S2 = var_pades.shape[1]
    S1p = _round_up(S1, SUB16)            # bf16-tile-clean sublane padding
    S2p = _round_up(S2, SUB16)
    Nc = Ocp + S2p

    # batch blocking: big blocks to fill the MXU, >=2 grid steps when possible (v7x: 2 TCs).
    Bp8 = _round_up(B, 8)
    BB = min(block_b, Bp8)
    if Bp8 > 8 and Bp8 // BB < 2:
        BB = _round_up((Bp8 + 1) // 2, 8)
    BB = max(BB, 8)
    Bp = _round_up(B, BB)

    # per-row f32 data slab with 128-lane-aligned sections
    w_lc = _round_up(2 * Hd, LANE)
    off_hl = w_lc
    off_src = off_hl + LANE
    off_cand = off_src + _round_up(S1p, LANE)
    D = off_cand + _round_up(Nc, LANE)

    src_bias = jnp.pad(source_mask.astype(F32) * NEG_INF,
                       ((0, 0), (0, S1p - S1)), constant_values=NEG_INF)                 # (B, S1p)
    cb = packed["vsb"] + candi_mask.astype(F32) * NEG_INF                                # (B, Oc+S2)
    cand_bias = jnp.concatenate(
        [jnp.pad(cb[:, :Oc], ((0, 0), (0, Ocp - Oc)), constant_values=NEG_INF),
         jnp.pad(cb[:, Oc:], ((0, 0), (0, S2p - S2)), constant_values=NEG_INF)], axis=1)  # (B, Nc)

    zer = lambda w: jnp.zeros((B, w), F32)
    data = jnp.concatenate([
        left_emb.astype(F32), cur_emb.astype(F32), zer(w_lc - 2 * Hd),
        has_left.astype(F32).reshape(B, 1), zer(off_src - off_hl - 1),
        src_bias, zer(off_cand - off_src - S1p),
        cand_bias, zer(D - off_cand - Nc)], axis=1)                                       # (B, D)

    padB = lambda x: jnp.pad(x, ((0, Bp - B),) + ((0, 0),) * (x.ndim - 1))
    data_p = padB(data)
    enc_p = padB(jnp.pad(encoder_outputs, ((0, 0), (0, S1p - S1), (0, 0))).astype(BF16))
    var_p = padB(jnp.pad(var_pades, ((0, 0), (0, S2p - S2), (0, 0))).astype(BF16))

    w_sc = _round_up(Nc, LANE)
    w_nd = _round_up(Hd, LANE)
    w_cx = _round_up(He, LANE)
    Dout_p = w_sc + w_nd + w_cx

    gate_slab, attn_slab, score_slab = packed["gate_slab"], packed["attn_slab"], packed["score_slab"]

    # VMEM budget from actual tile sizes (double-buffered blocks + slabs + f32 temps).
    slab_bytes = 2 * (gate_slab.size + attn_slab.size + score_slab.size)
    blk_bytes = BB * (D * 4 + S1p * He * 2 + S2p * E * 2 + Dout_p * 4)
    inter_bytes = 4 * BB * (S1p * (Hd + He) + Nc * E) * 4
    vmem_limit = int(min(max(2 * (blk_bytes + slab_bytes) + inter_bytes + (4 << 20),
                             32 << 20), 64 << 20))

    kernel = functools.partial(_prediction_kernel, Hd=Hd, He=He, E=E,
                               S1p=S1p, S2p=S2p, Ocp=Ocp,
                               off_hl=off_hl, off_src=off_src, off_cand=off_cand,
                               w_sc=w_sc, w_nd=w_nd, w_cx=w_cx)
    out = pl.pallas_call(
        kernel,
        grid=(Bp // BB,),
        in_specs=[
            pl.BlockSpec((BB, D), lambda i: (i, 0)),
            pl.BlockSpec((BB, S1p, He), lambda i: (i, 0, 0)),
            pl.BlockSpec((BB, S2p, E), lambda i: (i, 0, 0)),
            pl.BlockSpec(gate_slab.shape, lambda i: (0, 0)),
            pl.BlockSpec(attn_slab.shape, lambda i: (0, 0)),
            pl.BlockSpec(score_slab.shape, lambda i: (0, 0)),
        ],
        out_specs=pl.BlockSpec((BB, Dout_p), lambda i: (i, 0)),
        out_shape=jax.ShapeDtypeStruct((Bp, Dout_p), F32),
        compiler_params=pltpu.CompilerParams(dimension_semantics=("parallel",),
                                             vmem_limit_bytes=vmem_limit),
    )(data_p, enc_p, var_p, gate_slab, attn_slab, score_slab)

    # unpack the lane-aligned output sections
    num_score = jnp.concatenate([out[:B, :Oc], out[:B, Ocp:Ocp + S2]], axis=1)   # (B, Oc+S2)
    node = out[:B, w_sc:w_sc + Hd][:, None, :]                                   # (B, 1, Hd)
    ctx = out[:B, w_sc + w_nd:w_sc + w_nd + He][:, None, :]                      # (B, 1, He)
    emb_all = jnp.concatenate(
        [jnp.broadcast_to(packed["op_const"][None], (B, Oc, E)), var_pades.astype(F32)], axis=1)
    return num_score, node, ctx, emb_all


# ----------------------------------------------------------------------------- pure-JAX reference
def prediction_reference(params, cur_emb, left_emb, has_left,
                         encoder_outputs, var_pades, source_mask, candi_mask):
    B, S1, He = encoder_outputs.shape
    Hd = cur_emb.shape[-1]
    lin = lambda x, w, b: jnp.matmul(x, w.T) + b
    g_nl = jnp.tanh(lin(cur_emb, params["concat_l_w"], params["concat_l_b"]))
    t_nl = jax.nn.sigmoid(lin(cur_emb, params["concat_lg_w"], params["concat_lg_b"]))
    x_cat = jnp.concatenate([left_emb, cur_emb], axis=1)
    g_l = jnp.tanh(lin(x_cat, params["concat_r_w"], params["concat_r_b"]))
    t_l = jax.nn.sigmoid(lin(x_cat, params["concat_rg_w"], params["concat_rg_b"]))
    node = jnp.where(has_left[:, None] > 0, g_l * t_l, g_nl * t_nl)              # (B, Hd)
    node_rep = jnp.broadcast_to(node[:, None, :], (B, S1, Hd))
    energy = jnp.tanh(lin(jnp.concatenate([node_rep, encoder_outputs], 2),
                          params["attn_attn_w"], params["attn_attn_b"]))
    att = lin(energy, params["attn_score_w"], params["attn_score_b"])[..., 0]
    att = jnp.where(source_mask > 0, NEG_INF, att)
    attw = jax.nn.softmax(att, axis=1)
    ctx = jnp.einsum("bs,bsh->bh", attw, encoder_outputs)                        # (B, He)
    op_c = params["embedding_op_const"]
    emb_all = jnp.concatenate([jnp.broadcast_to(op_c[None], (B,) + op_c.shape), var_pades], 1)
    O = emb_all.shape[1]
    leaf = jnp.concatenate([node, ctx], axis=1)
    leaf_rep = jnp.broadcast_to(leaf[:, None, :], (B, O, leaf.shape[-1]))
    e2 = jnp.tanh(lin(jnp.concatenate([leaf_rep, emb_all], 2),
                      params["score_attn_w"], params["score_attn_b"]))
    sc = lin(e2, params["score_score_w"], params["score_score_b"])[..., 0]
    sc = jnp.where(candi_mask > 0, NEG_INF, sc)
    return sc, node[:, None, :], ctx[:, None, :], emb_all


# ----------------------------------------------------------------------------- main
if __name__ == "__main__":
    B, S1, S2 = 2, 8, 3
    Hd, He, E = 32, 32, 32           # decoder hidden, encoder hidden, decoder embedding
    op_const_size = 5
    O = op_const_size + S2

    key = jax.random.PRNGKey(0)
    ks = jax.random.split(key, 24)
    n = lambda k, s: (0.1 * jax.random.normal(k, s)).astype(F32)

    params = {
        "concat_l_w":  n(ks[0], (Hd, Hd)),       "concat_l_b":  n(ks[1], (Hd,)),
        "concat_r_w":  n(ks[2], (Hd, 2 * Hd)),   "concat_r_b":  n(ks[3], (Hd,)),
        "concat_lg_w": n(ks[4], (Hd, Hd)),       "concat_lg_b": n(ks[5], (Hd,)),
        "concat_rg_w": n(ks[6], (Hd, 2 * Hd)),   "concat_rg_b": n(ks[7], (Hd,)),
        "attn_attn_w": n(ks[8], (Hd, Hd + He)),  "attn_attn_b": n(ks[9], (Hd,)),
        "attn_score_w": n(ks[10], (1, Hd)),      "attn_score_b": n(ks[11], (1,)),
        "score_attn_w": n(ks[12], (E, Hd + He + E)), "score_attn_b": n(ks[13], (E,)),
        "score_score_w": n(ks[14], (1, E)),      "score_score_b": n(ks[15], (1,)),
        "embedding_op_const": n(ks[16], (op_const_size, E)),
    }

    # node_stacks / left_child_trees represented densely:
    #   batch 0: no left child (concat_l branch); batch 1: left child present (concat_r branch).
    cur_emb = n(ks[17], (B, Hd))
    left_emb = n(ks[18], (B, Hd))
    has_left = jnp.array([0.0, 1.0], dtype=F32)
    encoder_outputs = n(ks[19], (B, S1, He))
    var_pades = n(ks[20], (B, S2, E))
    source_mask = jnp.zeros((B, S1), F32).at[1, 6:].set(1.0)   # 1 = padded position
    candi_mask = jnp.zeros((B, O), F32).at[0, 7:].set(1.0)     # 1 = invalid candidate

    packed = pack_prediction_params(params)                    # once per model
    outs = prediction_forward(packed, cur_emb, left_emb, has_left,
                              encoder_outputs, var_pades, source_mask, candi_mask)
    outs = jax.block_until_ready(outs)

    refs = prediction_reference(params, cur_emb, left_emb, has_left,
                                encoder_outputs, var_pades, source_mask, candi_mask)
    # tolerance 1e-2: enc/var/weights are streamed in bf16 (f32 accumulation), softmax uses an
    # approx reciprocal, and masking is additive -1e12 (masked entries match within rtol*1e12).
    for o, r in zip(outs, refs):
        assert o.shape == r.shape, (o.shape, r.shape)
        assert jnp.allclose(o, r, rtol=1e-2, atol=1e-2), float(jnp.max(jnp.abs(o - r)))

    print("KERNEL_OK")
</pallas_src>

<mosaic_0001>
module attributes {stable_mosaic.version = 11 : i64} {
  func.func @_prediction_kernel(%arg0: i32, %arg1: memref<8x512xf32, #tpu.memory_space<vmem>>, %arg2: memref<8x16x32xbf16, #tpu.memory_space<vmem>>, %arg3: memref<8x16x32xbf16, #tpu.memory_space<vmem>>, %arg4: memref<98x64xbf16, #tpu.memory_space<vmem>>, %arg5: memref<66x32xbf16, #tpu.memory_space<vmem>>, %arg6: memref<106x32xbf16, #tpu.memory_space<vmem>>, %arg7: memref<8x384xf32, #tpu.memory_space<vmem>>) attributes {dimension_semantics = [#tpu.dimension_semantics<parallel>], iteration_bounds = array<i64: 1>, scalar_prefetch = 0 : i64, scratch_operands = 0 : i64, tpu.core_type = #tpu.core_type<tc>, window_params = [{transform_indices = @transform_0, window_bounds = array<i64: 8, 512>}, {transform_indices = @transform_1, window_bounds = array<i64: 8, 16, 32>}, {transform_indices = @transform_2, window_bounds = array<i64: 8, 16, 32>}, {pipeline_mode = #tpu.pipeline_mode<synchronous>, transform_indices = @transform_3, window_bounds = array<i64: 98, 64>}, {pipeline_mode = #tpu.pipeline_mode<synchronous>, transform_indices = @transform_4, window_bounds = array<i64: 66, 32>}, {pipeline_mode = #tpu.pipeline_mode<synchronous>, transform_indices = @transform_5, window_bounds = array<i64: 106, 32>}, {transform_indices = @transform_6, window_bounds = array<i64: 8, 384>}]} {
    %c0 = arith.constant 0 : index
    %c0_0 = arith.constant 0 : index
    %0 = vector.load %arg1[%c0, %c0_0] : memref<8x512xf32, #tpu.memory_space<vmem>>, vector<8x512xf32>
    %1 = vector.extract_strided_slice %0 {offsets = [0, 0], sizes = [8, 64], strides = [1, 1]} : vector<8x512xf32> to vector<8x64xf32>
    %2 = arith.truncf %1 : vector<8x64xf32> to vector<8x64xbf16>
    %3 = vector.extract_strided_slice %0 {offsets = [0, 128], sizes = [8, 1], strides = [1, 1]} : vector<8x512xf32> to vector<8x1xf32>
    %4 = vector.extract_strided_slice %0 {offsets = [0, 256], sizes = [8, 16], strides = [1, 1]} : vector<8x512xf32> to vector<8x16xf32>
    %5 = vector.extract_strided_slice %0 {offsets = [0, 384], sizes = [8, 24], strides = [1, 1]} : vector<8x512xf32> to vector<8x24xf32>
    %c0_1 = arith.constant 0 : index
    %c0_2 = arith.constant 0 : index
    %6 = vector.load %arg4[%c0_1, %c0_2] : memref<98x64xbf16, #tpu.memory_space<vmem>>, vector<64x64xbf16>
    %cst = arith.constant dense<0.000000e+00> : vector<8x64xf32>
    %7 = tpu.matmul %2, %6, %cst {dimension_numbers = #tpu.dot_dimension_numbers<[1], [0], [0], [1], [0, 0, 1, 1], [], []>} : vector<8x64xbf16>, vector<64x64xbf16>, vector<8x64xf32> -> vector<8x64xf32>
    %c96 = arith.constant 96 : index
    %c0_3 = arith.constant 0 : index
    %8 = vector.load %arg4[%c96, %c0_3] : memref<98x64xbf16, #tpu.memory_space<vmem>>, vector<1x64xbf16>
    %9 = vector.shape_cast %8 : vector<1x64xbf16> to vector<64xbf16>
    %10 = arith.extf %9 : vector<64xbf16> to vector<64xf32>
    %11 = vector.shape_cast %10 : vector<64xf32> to vector<1x64xf32>
    %12 = vector.broadcast %11 : vector<1x64xf32> to vector<8x64xf32>
    %13 = arith.addf %7, %12 : vector<8x64xf32>
    %14 = vector.extract_strided_slice %2 {offsets = [0, 32], sizes = [8, 32], strides = [1, 1]} : vector<8x64xbf16> to vector<8x32xbf16>
    %c64 = arith.constant 64 : index
    %c0_4 = arith.constant 0 : index
    %15 = vector.load %arg4[%c64, %c0_4] : memref<98x64xbf16, #tpu.memory_space<vmem>>, vector<32x64xbf16>
    %cst_5 = arith.constant dense<0.000000e+00> : vector<8x64xf32>
    %16 = tpu.matmul %14, %15, %cst_5 {dimension_numbers = #tpu.dot_dimension_numbers<[1], [0], [0], [1], [0, 0, 1, 1], [], []>} : vector<8x32xbf16>, vector<32x64xbf16>, vector<8x64xf32> -> vector<8x64xf32>
    %c97 = arith.constant 97 : index
    %c0_6 = arith.constant 0 : index
    %17 = vector.load %arg4[%c97, %c0_6] : memref<98x64xbf16, #tpu.memory_space<vmem>>, vector<1x64xbf16>
    %18 = vector.shape_cast %17 : vector<1x64xbf16> to vector<64xbf16>
    %19 = arith.extf %18 : vector<64xbf16> to vector<64xf32>
    %20 = vector.shape_cast %19 : vector<64xf32> to vector<1x64xf32>
    %21 = vector.broadcast %20 : vector<1x64xf32> to vector<8x64xf32>
    %22 = arith.addf %16, %21 : vector<8x64xf32>
    %23 = vector.extract_strided_slice %13 {offsets = [0, 0], sizes = [8, 32], strides = [1, 1]} : vector<8x64xf32> to vector<8x32xf32>
    %24 = math.tanh %23 : vector<8x32xf32>
    %25 = vector.extract_strided_slice %13 {offsets = [0, 32], sizes = [8, 32], strides = [1, 1]} : vector<8x64xf32> to vector<8x32xf32>
    %26 = arith.negf %25 : vector<8x32xf32>
    %27 = math.exp %26 : vector<8x32xf32>
    %cst_7 = arith.constant 1.000000e+00 : f32
    %28 = vector.broadcast %cst_7 : f32 to vector<8x32xf32>
    %29 = arith.addf %28, %27 : vector<8x32xf32>
    %30 = arith.divf %28, %29 : vector<8x32xf32>
    %31 = arith.mulf %24, %30 : vector<8x32xf32>
    %32 = vector.extract_strided_slice %22 {offsets = [0, 0], sizes = [8, 32], strides = [1, 1]} : vector<8x64xf32> to vector<8x32xf32>
    %33 = math.tanh %32 : vector<8x32xf32>
    %34 = vector.extract_strided_slice %22 {offsets = [0, 32], sizes = [8, 32], strides = [1, 1]} : vector<8x64xf32> to vector<8x32xf32>
    %35 = arith.negf %34 : vector<8x32xf32>
    %36 = math.exp %35 : vector<8x32xf32>
    %cst_8 = arith.constant 1.000000e+00 : f32
    %37 = vector.broadcast %cst_8 : f32 to vector<8x32xf32>
    %38 = arith.addf %37, %36 : vector<8x32xf32>
    %39 = arith.divf %37, %38 : vector<8x32xf32>
    %40 = arith.mulf %33, %39 : vector<8x32xf32>
    %cst_9 = arith.constant 0.000000e+00 : f32
    %41 = vector.broadcast %cst_9 : f32 to vector<8x1xf32>
    %42 = arith.cmpf ogt, %3, %41 : vector<8x1xf32>
    %43 = vector.shape_cast %42 : vector<8x1xi1> to vector<8x1xi1>
    %44 = vector.broadcast %43 : vector<8x1xi1> to vector<8x32xi1>
    %45 = arith.select %44, %31, %40 : vector<8x32xi1>, vector<8x32xf32>
    %46 = arith.truncf %45 : vector<8x32xf32> to vector<8x32xbf16>
    %c0_10 = arith.constant 0 : index
    %c0_11 = arith.constant 0 : index
    %c0_12 = arith.constant 0 : index
    %47 = vector.load %arg2[%c0_10, %c0_11, %c0_12] : memref<8x16x32xbf16, #tpu.memory_space<vmem>>, vector<8x16x32xbf16>
    %48 = vector.shape_cast %47 : vector<8x16x32xbf16> to vector<128x32xbf16>
    %c32 = arith.constant 32 : index
    %c0_13 = arith.constant 0 : index
    %49 = vector.load %arg5[%c32, %c0_13] : memref<66x32xbf16, #tpu.memory_space<vmem>>, vector<32x32xbf16>
    %cst_14 = arith.constant dense<0.000000e+00> : vector<128x32xf32>
    %50 = tpu.matmul %48, %49, %cst_14 {dimension_numbers = #tpu.dot_dimension_numbers<[1], [0], [0], [1], [0, 0, 1, 1], [], []>} : vector<128x32xbf16>, vector<32x32xbf16>, vector<128x32xf32> -> vector<128x32xf32>
    %51 = vector.shape_cast %50 : vector<128x32xf32> to vector<8x16x32xf32>
    %c0_15 = arith.constant 0 : index
    %c0_16 = arith.constant 0 : index
    %52 = vector.load %arg5[%c0_15, %c0_16] : memref<66x32xbf16, #tpu.memory_space<vmem>>, vector<32x32xbf16>
    %cst_17 = arith.constant dense<0.000000e+00> : vector<8x32xf32>
    %53 = tpu.matmul %46, %52, %cst_17 {dimension_numbers = #tpu.dot_dimension_numbers<[1], [0], [0], [1], [0, 0, 1, 1], [], []>} : vector<8x32xbf16>, vector<32x32xbf16>, vector<8x32xf32> -> vector<8x32xf32>
    %c64_18 = arith.constant 64 : index
    %c0_19 = arith.constant 0 : index
    %54 = vector.load %arg5[%c64_18, %c0_19] : memref<66x32xbf16, #tpu.memory_space<vmem>>, vector<1x32xbf16>
    %55 = vector.shape_cast %54 : vector<1x32xbf16> to vector<32xbf16>
    %56 = arith.extf %55 : vector<32xbf16> to vector<32xf32>
    %57 = vector.shape_cast %56 : vector<32xf32> to vector<1x32xf32>
    %58 = vector.broadcast %57 : vector<1x32xf32> to vector<8x32xf32>
    %59 = arith.addf %53, %58 : vector<8x32xf32>
    %60 = vector.shape_cast %59 : vector<8x32xf32> to vector<8x1x32xf32>
    %61 = vector.broadcast %60 : vector<8x1x32xf32> to vector<8x16x32xf32>
    %62 = arith.addf %51, %61 : vector<8x16x32xf32>
    %63 = math.tanh %62 : vector<8x16x32xf32>
    %c65 = arith.constant 65 : index
    %c0_20 = arith.constant 0 : index
    %64 = vector.load %arg5[%c65, %c0_20] : memref<66x32xbf16, #tpu.memory_space<vmem>>, vector<1x32xbf16>
    %65 = vector.shape_cast %64 : vector<1x32xbf16> to vector<32xbf16>
    %66 = arith.extf %65 : vector<32xbf16> to vector<32xf32>
    %67 = vector.shape_cast %66 : vector<32xf32> to vector<1x1x32xf32>
    %68 = vector.broadcast %67 : vector<1x1x32xf32> to vector<8x16x32xf32>
    %69 = arith.mulf %63, %68 : vector<8x16x32xf32>
    %cst_21 = arith.constant dense<0.000000e+00> : vector<8x16xf32>
    %70 = vector.multi_reduction <add>, %69, %cst_21 [2] : vector<8x16x32xf32> to vector<8x16xf32>
    %71 = arith.addf %70, %4 : vector<8x16xf32>
    %cst_22 = arith.constant dense<0xFF800000> : vector<8xf32>
    %72 = vector.multi_reduction <maximumf>, %71, %cst_22 [1] : vector<8x16xf32> to vector<8xf32>
    %73 = vector.shape_cast %72 : vector<8xf32> to vector<8x1xf32>
    %74 = vector.broadcast %73 : vector<8x1xf32> to vector<8x16xf32>
    %75 = arith.subf %71, %74 : vector<8x16xf32>
    %76 = math.exp %75 : vector<8x16xf32>
    %cst_23 = arith.constant dense<0.000000e+00> : vector<8xf32>
    %77 = vector.multi_reduction <add>, %76, %cst_23 [1] : vector<8x16xf32> to vector<8xf32>
    %78 = vector.shape_cast %77 : vector<8xf32> to vector<8x1xf32>
    %79 = tpu.reciprocal %78 {approx = true} : vector<8x1xf32> -> vector<8x1xf32>
    %80 = vector.broadcast %79 : vector<8x1xf32> to vector<8x16xf32>
    %81 = arith.mulf %76, %80 : vector<8x16xf32>
    %82 = arith.truncf %81 : vector<8x16xf32> to vector<8x16xbf16>
    %83 = vector.shape_cast %82 : vector<8x16xbf16> to vector<8x1x16xbf16>
    "tpu.trace_start"() <{level = 10 : i32, message = "bqs,bse->bqe"}> : () -> ()
    %cst_24 = arith.constant dense<0.000000e+00> : vector<8x1x32xf32>
    %84 = tpu.matmul %83, %47, %cst_24 {dimension_numbers = #tpu.dot_dimension_numbers<[2], [1], [1], [2], [0, 0, 0, 1, 1, 2], [0], [0]>} : vector<8x1x16xbf16>, vector<8x16x32xbf16>, vector<8x1x32xf32> -> vector<8x1x32xf32>
    "tpu.trace_stop"() : () -> ()
    %85 = vector.shape_cast %84 : vector<8x1x32xf32> to vector<8x32xf32>
    %86 = arith.truncf %85 : vector<8x32xf32> to vector<8x32xbf16>
    %c0_25 = arith.constant 0 : index
    %c0_26 = arith.constant 0 : index
    %87 = vector.load %arg6[%c0_25, %c0_26] : memref<106x32xbf16, #tpu.memory_space<vmem>>, vector<32x32xbf16>
    %c32_27 = arith.constant 32 : index
    %c0_28 = arith.constant 0 : index
    %88 = vector.load %arg6[%c32_27, %c0_28] : memref<106x32xbf16, #tpu.memory_space<vmem>>, vector<32x32xbf16>
    %c64_29 = arith.constant 64 : index
    %c0_30 = arith.constant 0 : index
    %89 = vector.load %arg6[%c64_29, %c0_30] : memref<106x32xbf16, #tpu.memory_space<vmem>>, vector<32x32xbf16>
    %c96_31 = arith.constant 96 : index
    %c0_32 = arith.constant 0 : index
    %90 = vector.load %arg6[%c96_31, %c0_32] : memref<106x32xbf16, #tpu.memory_space<vmem>>, vector<8x32xbf16>
    %91 = arith.extf %90 : vector<8x32xbf16> to vector<8x32xf32>
    %c104 = arith.constant 104 : index
    %c0_33 = arith.constant 0 : index
    %92 = vector.load %arg6[%c104, %c0_33] : memref<106x32xbf16, #tpu.memory_space<vmem>>, vector<1x32xbf16>
    %93 = vector.shape_cast %92 : vector<1x32xbf16> to vector<32xbf16>
    %94 = arith.extf %93 : vector<32xbf16> to vector<32xf32>
    %c105 = arith.constant 105 : index
    %c0_34 = arith.constant 0 : index
    %95 = vector.load %arg6[%c105, %c0_34] : memref<106x32xbf16, #tpu.memory_space<vmem>>, vector<1x32xbf16>
    %96 = vector.shape_cast %95 : vector<1x32xbf16> to vector<32xbf16>
    %cst_35 = arith.constant dense<0.000000e+00> : vector<8x32xf32>
    %97 = tpu.matmul %46, %87, %cst_35 {dimension_numbers = #tpu.dot_dimension_numbers<[1], [0], [0], [1], [0, 0, 1, 1], [], []>} : vector<8x32xbf16>, vector<32x32xbf16>, vector<8x32xf32> -> vector<8x32xf32>
    %cst_36 = arith.constant dense<0.000000e+00> : vector<8x32xf32>
    %98 = tpu.matmul %86, %88, %cst_36 {dimension_numbers = #tpu.dot_dimension_numbers<[1], [0], [0], [1], [0, 0, 1, 1], [], []>} : vector<8x32xbf16>, vector<32x32xbf16>, vector<8x32xf32> -> vector<8x32xf32>
    %99 = arith.addf %97, %98 : vector<8x32xf32>
    %100 = vector.shape_cast %94 : vector<32xf32> to vector<1x32xf32>
    %101 = vector.broadcast %100 : vector<1x32xf32> to vector<8x32xf32>
    %102 = arith.addf %99, %101 : vector<8x32xf32>
    %c0_37 = arith.constant 0 : index
    %c0_38 = arith.constant 0 : index
    %c0_39 = arith.constant 0 : index
    %103 = vector.load %arg3[%c0_37, %c0_38, %c0_39] : memref<8x16x32xbf16, #tpu.memory_space<vmem>>, vector<8x16x32xbf16>
    %104 = vector.shape_cast %103 : vector<8x16x32xbf16> to vector<128x32xbf16>
    %cst_40 = arith.constant dense<0.000000e+00> : vector<128x32xf32>
    %105 = tpu.matmul %104, %89, %cst_40 {dimension_numbers = #tpu.dot_dimension_numbers<[1], [0], [0], [1], [0, 0, 1, 1], [], []>} : vector<128x32xbf16>, vector<32x32xbf16>, vector<128x32xf32> -> vector<128x32xf32>
    %106 = vector.shape_cast %105 : vector<128x32xf32> to vector<8x16x32xf32>
    %107 = vector.shape_cast %91 : vector<8x32xf32> to vector<1x8x32xf32>
    %108 = vector.shape_cast %102 : vector<8x32xf32> to vector<8x1x32xf32>
    %109 = vector.broadcast %107 : vector<1x8x32xf32> to vector<8x8x32xf32>
    %110 = vector.broadcast %108 : vector<8x1x32xf32> to vector<8x8x32xf32>
    %111 = arith.addf %109, %110 : vector<8x8x32xf32>
    %112 = math.tanh %111 : vector<8x8x32xf32>
    %113 = arith.extf %96 : vector<32xbf16> to vector<32xf32>
    %114 = vector.shape_cast %113 : vector<32xf32> to vector<1x1x32xf32>
    %115 = vector.broadcast %114 : vector<1x1x32xf32> to vector<8x8x32xf32>
    %116 = arith.mulf %112, %115 : vector<8x8x32xf32>
    %cst_41 = arith.constant dense<0.000000e+00> : vector<8x8xf32>
    %117 = vector.multi_reduction <add>, %116, %cst_41 [2] : vector<8x8x32xf32> to vector<8x8xf32>
    %118 = vector.shape_cast %102 : vector<8x32xf32> to vector<8x1x32xf32>
    %119 = vector.broadcast %118 : vector<8x1x32xf32> to vector<8x16x32xf32>
    %120 = arith.addf %106, %119 : vector<8x16x32xf32>
    %121 = math.tanh %120 : vector<8x16x32xf32>
    %122 = arith.extf %96 : vector<32xbf16> to vector<32xf32>
    %123 = vector.shape_cast %122 : vector<32xf32> to vector<1x1x32xf32>
    %124 = vector.broadcast %123 : vector<1x1x32xf32> to vector<8x16x32xf32>
    %125 = arith.mulf %121, %124 : vector<8x16x32xf32>
    %cst_42 = arith.constant dense<0.000000e+00> : vector<8x16xf32>
    %126 = vector.multi_reduction <add>, %125, %cst_42 [2] : vector<8x16x32xf32> to vector<8x16xf32>
    %127 = tpu.concatenate %117, %126 in 1 : vector<8x8xf32>, vector<8x16xf32> -> vector<8x24xf32>
    %128 = arith.addf %127, %5 : vector<8x24xf32>
    %cst_43 = arith.constant 0.000000e+00 : f32
    %129 = vector.broadcast %cst_43 : f32 to vector<8x104xf32>
    %130 = tpu.concatenate %128, %129 in 1 : vector<8x24xf32>, vector<8x104xf32> -> vector<8x128xf32>
    %c0_44 = arith.constant 0 : index
    %c0_45 = arith.constant 0 : index
    %131 = vector.load %arg7[%c0_44, %c0_45] : memref<8x384xf32, #tpu.memory_space<vmem>>, vector<8x128xf32>
    tpu.vector_store %arg7[%c0_44, %c0_45], %130 {strides = array<i32>} : memref<8x384xf32, #tpu.memory_space<vmem>>, vector<8x128xf32>,
    %cst_46 = arith.constant 0.000000e+00 : f32
    %132 = vector.broadcast %cst_46 : f32 to vector<8x96xf32>
    %133 = tpu.concatenate %45, %132 in 1 : vector<8x32xf32>, vector<8x96xf32> -> vector<8x128xf32>
    %c0_47 = arith.constant 0 : index
    %c128 = arith.constant 128 : index
    %134 = vector.load %arg7[%c0_47, %c128] : memref<8x384xf32, #tpu.memory_space<vmem>>, vector<8x128xf32>
    tpu.vector_store %arg7[%c0_47, %c128], %133 {strides = array<i32>} : memref<8x384xf32, #tpu.memory_space<vmem>>, vector<8x128xf32>,
    %cst_48 = arith.constant 0.000000e+00 : f32
    %135 = vector.broadcast %cst_48 : f32 to vector<8x96xf32>
    %136 = tpu.concatenate %85, %135 in 1 : vector<8x32xf32>, vector<8x96xf32> -> vector<8x128xf32>
    %c0_49 = arith.constant 0 : index
    %c256 = arith.constant 256 : index
    %137 = vector.load %arg7[%c0_49, %c256] : memref<8x384xf32, #tpu.memory_space<vmem>>, vector<8x128xf32>
    tpu.vector_store %arg7[%c0_49, %c256], %136 {strides = array<i32>} : memref<8x384xf32, #tpu.memory_space<vmem>>, vector<8x128xf32>,
    return
  }
  func.func @transform_0(%arg0: i32) -> (i32, i32) {
    %c0_i32 = arith.constant 0 : i32
    %c0_i32_0 = arith.constant 0 : i32
    return %arg0, %c0_i32 : i32, i32
  }
  func.func @transform_1(%arg0: i32) -> (i32, i32, i32) {
    %c0_i32 = arith.constant 0 : i32
    %c0_i32_0 = arith.constant 0 : i32
    %c0_i32_1 = arith.constant 0 : i32
    return %arg0, %c0_i32, %c0_i32_0 : i32, i32, i32
  }
  func.func @transform_2(%arg0: i32) -> (i32, i32, i32) {
    %c0_i32 = arith.constant 0 : i32
    %c0_i32_0 = arith.constant 0 : i32
    %c0_i32_1 = arith.constant 0 : i32
    return %arg0, %c0_i32, %c0_i32_0 : i32, i32, i32
  }
  func.func @transform_3(%arg0: i32) -> (i32, i32) {
    %c0_i32 = arith.constant 0 : i32
    %c0_i32_0 = arith.constant 0 : i32
    %c0_i32_1 = arith.constant 0 : i32
    return %c0_i32, %c0_i32_0 : i32, i32
  }
  func.func @transform_4(%arg0: i32) -> (i32, i32) {
    %c0_i32 = arith.constant 0 : i32
    %c0_i32_0 = arith.constant 0 : i32
    %c0_i32_1 = arith.constant 0 : i32
    return %c0_i32, %c0_i32_0 : i32, i32
  }
  func.func @transform_5(%arg0: i32) -> (i32, i32) {
    %c0_i32 = arith.constant 0 : i32
    %c0_i32_0 = arith.constant 0 : i32
    %c0_i32_1 = arith.constant 0 : i32
    return %c0_i32, %c0_i32_0 : i32, i32
  }
  func.func @transform_6(%arg0: i32) -> (i32, i32) {
    %c0_i32 = arith.constant 0 : i32
    %c0_i32_0 = arith.constant 0 : i32
    return %arg0, %c0_i32 : i32, i32
  }
}

</mosaic_0001>

<bundles_post_ra>
// kernel: tpu_custom_call.1
= control target key start
LH: loop header
LB: loop body
LE: loop exit
PB: predicated region body
PF: predicated region fallthrough
CT: control target
= control target key end

     0   :  { %v2978_v1 = vmov 0.0   ;;  %vm2979_vm0 = vmmov 0   ;;  %s2980_s27 = smov 96   ;;  %vm68_vm1 = vcmask 523264   ;;  %s3758_s0 = inlined_call_operand.vmem [shape: f32[8,512], index: 0, kind: input, shape index: {}]   ;;  %s3759_s1 = inlined_call_operand.vmem [shape: bf16[8,16,32], index: 1, kind: input, shape index: {}]   ;;  %s3760_s2 = inlined_call_operand.vmem [shape: bf16[8,16,32], index: 2, kind: input, shape index: {}]   ;;  %s3761_s3 = inlined_call_operand.vmem [shape: bf16[98,64], index: 3, kind: input, shape index: {}]   ;;  %s3762_s4 = inlined_call_operand.vmem [shape: bf16[66,32], index: 4, kind: input, shape index: {}]   ;;  %s3763_s5 = inlined_call_operand.vmem [shape: bf16[106,32], index: 5, kind: input, shape index: {}]   ;;  %s3764_s6 = inlined_call_operand.hbm [shape: f32[8,384], index: 6, kind: output, shape index: {}]  }
   0x1   :  { %v2790_v0 = vld [vmem:[%s3761_s3] sm:$0xff]   ;;  %2650 = vmatprep.subr.bf16.mxu1 %v2978_v1  ;;  %2690 = vmatprep.subr.bf16.mxu0 %v2978_v1  ;;  %v2791_v4 = vld [vmem:[%s3761_s3 + $0x8] sm:$0xff]   ;;  %v2792_v5 = vld [vmem:[%s3761_s3 + $0x10] sm:$0xff]  }
   0x2   :  { %v25_v2 = vld [vmem:[%s3758_s0] sm:$0xff]  ;;  %2651 = vmatpush3.bf16.msra.mxu1 %v2790_v0  ;;  %2658 = vmatprep.mubr.msk.bf16.mxu1 %vm2979_vm0, %v2978_v1  ;;  %v2793_v6 = vld [vmem:[%s3761_s3 + $0x18] sm:$0xff]   ;;  %v2795_v8 = vld [vmem:[%s3761_s3 + $0x28] sm:$0xff]  }
   0x3   :  { %v29_v3 = vpack.c.bf16 %v25_v2, %v25_v2  ;;  %2652 = vmatprep.subr.bf16.mxu1 %v2978_v1  ;;  %2694 = vmatprep.mubr.msk.bf16.mxu0 %vm2979_vm0, %v2978_v1  ;;  %v2794_v7 = vld [vmem:[%s3761_s3 + $0x20] sm:$0xff]  }
   0x5   :  { %121 = vrot.lane.b32.xlu0 %v29_v3, %s2980_s27 }
   0x6   :  { %2653 = vmatpush3.bf16.msra.mxu1 %v2791_v4 }
   0x7   :  { %2654 = vmatprep.subr.bf16.mxu1 %v2978_v1 }
   0xa   :  { %2655 = vmatpush3.bf16.msra.mxu1 %v2792_v5 }
   0xb   :  { %2656 = vmatprep.subr.bf16.mxu1 %v2978_v1 }
   0xe   :  { %2657 = vmatpush3.bf16.msra.mxu1 %v2793_v6 }
   0xf   :  { %2662 = vmatprep.subr.bf16.mxu1 %v2978_v1 }
  0x11   :  { %2659 = vmatmul.mubr.msk.bf16.vlgmr.msra.gmra.mrb[0].mxu1 %vm68_vm1, %v29_v3 }
  0x12   :  { %2663 = vmatpush3.bf16.msra.mxu1 %v2794_v7  ;;  %2666 = vmatprep.mubr.msk.bf16.mxu1 %vm2979_vm0, %v2978_v1 }
  0x13   :  { %2664 = vmatprep.subr.bf16.mxu1 %v2978_v1 }
  0x16   :  { %2665 = vmatpush3.bf16.msra.mxu1 %v2795_v8 }
  0x17   :  { %11 = vsyncpa [#allocation3], 0  ;;  %vm135_vm2 = vcmask 261120   ;;  %v40_v10 = vlaneseq  ;;  %v26_v11 = vld [vmem:[%s3758_s0 + $0x8] sm:$0xff]  ;;  %v38_v13 = vld [vmem:[%s3761_s3 + $0x30] sm:$0x1] }
  0x18   :  { %vm203_vm3 = vcmp.gt.f32.partialorder %v26_v11, 0.0  ;;  %v2981_v14 = vmov 0   ;;  %v39_v16 = vunpack.c.l.bf16 %v38_v13  ;;  %v2796_v27 = vld [vmem:[%s3762_s4 + $0x10] sm:$0xff]   ;;  %v2797_v28 = vld [vmem:[%s3762_s4 + $0x18] sm:$0xff]   ;;  %v3080_v29 = vld [vmem:[%s3759_s1] sm:$0xff]   ;;  %vm857_vm5 = vcmask 130112  }
  0x19   :  { %v3059_v12 = vshrl.u32 %v40_v10, 7  ;;  %2788 = vset.pattern.permute.xlu0 %v2981_v14  ;;  %v204_v15 = vsel %vm203_vm3, 1, %v2981_v14  ;;  %2789 = vset.pattern.permute.xlu1 %v2981_v14  ;;  %v2802_v30 = vld [vmem:[%s3762_s4] sm:$0xff]   ;;  %v2799_v31 = vld [vmem:[%s3759_s1 + $0x8] sm:$0xff]   ;;  %v2800_v32 = vld [vmem:[%s3759_s1 + $0x10] sm:$0xff]   ;;  %vm922_vm6 = vcmask 1041409  }
  0x1a   :  { %206 = vperm.xlu0 %2788, %v204_v15   ;;  %2670 = vmatprep.subr.bf16.mxu1 %v2796_v27  ;;  %v2801_v33 = vld [vmem:[%s3759_s1 + $0x18] sm:$0xff]   ;;  %v2803_v45 = vld [vmem:[%s3762_s4 + $0x8] sm:$0xff]   ;;  %v2804_v46 = vld [vmem:[%s3759_s1 + $0x20] sm:$0xff]   ;;  %vm924_vm7 = vcmask 1042434   ;;  %vm926_vm8 = vcmask 1043459   ;;  %vm928_vm9 = vcmask 1044484  }
  0x1b   :  { %v3065_v17 = vsub.s32 0, %v3059_v12  ;;  %2691 = vmatpush3.bf16.msra.mxu0 %v2802_v30  ;;  %v3104_v35 = vsub.s32 1, %v3059_v12  ;;  %v2805_v47 = vld [vmem:[%s3759_s1 + $0x28] sm:$0xff]   ;;  %v2806_v48 = vld [vmem:[%s3759_s1 + $0x30] sm:$0xff]   ;;  %v2807_v51 = vld [vmem:[%s3759_s1 + $0x38] sm:$0xff]   ;;  %v3136_v53 = vsub.s32 2, %v3059_v12 }
  0x1c   :  { %2692 = vmatprep.subr.bf16.mxu0 %v2978_v1  ;;  %v3124_v49 = vld [vmem:[%s3758_s0 + $0x10] sm:$0xff]  ;;  %v3143_v56 = vsub.s32 3, %v3059_v12  ;;  %v3150_v58 = vsub.s32 4, %v3059_v12  ;;  %v3155_v60 = vsub.s32 5, %v3059_v12  ;;  %v3160_v62 = vsub.s32 6, %v3059_v12  ;;  %s2983_s12 = smov [#allocation2]  }
  0x1d   :  { %v43_v18 = vrot.slane %v39_v16, %v3065_v17  ;;  %v119_v36 = vrot.slane %v39_v16, %v3104_v35  ;;  %v665_v50 = vrot.slane %v3124_v49, %v3065_v17  ;;  %v676_v52 = vrot.slane %v3124_v49, %v3104_v35  ;;  %s2526_s13 = sshll.u32 %s2983_s12, 4  ;;  %s2527_s13 = int_to_ptr.vmem [resolvable:$true] %s2526_s13 }
  0x1e   :  { %v687_v55 = vrot.slane %v3124_v49, %v3136_v53  ;;  %v698_v57 = vrot.slane %v3124_v49, %v3143_v56  ;;  %v709_v59 = vrot.slane %v3124_v49, %v3150_v58  ;;  %v720_v61 = vrot.slane %v3124_v49, %v3155_v60  ;;  %s2954_s14 = scalar_lea.vmem %s2527_s13, 384  ;;  %p2959_p1 = scmp.lt.s32.totalorder %s2527_s13, %s2527_s13 }
  0x1f   :  { %2693 = vmatpush3.bf16.msra.mxu0 %v2803_v45  ;;  %667 = vbcast.lane.b32.xlu0 %v665_v50, 256  ;;  %v731_v63 = vrot.slane %v3124_v49, %v3160_v62  ;;  %v591_v45 = vld [vmem:[%s3762_s4 + $0x20] sm:$0x1]  ;;  %vm930_vm10 = vcmask 1045509   ;;  %vm932_vm11 = vcmask 1046534   ;;  %vm934_vm12 = vcmask 1047559   ;;  %p2955_p0 = scmp.ne.s32.totalorder %s2527_s13, %s2954_s14  ;;  %p2960_p2 = scmp.lt.s32.totalorder %s2954_s14, %s2954_s14 }
  0x20   :  { %2698 = vmatprep.subr.bf16.mxu0 %v2978_v1  ;;  %vm937_vm13 = vcmask 130048   ;;  %vm2414_vm14 = vcmask 195712   ;;  %vm2487_vm15 = vcmask 64512  }
  0x21   :  { %p2961_p3 = por %p2960_p2, %p2959_p1 }
  0x23   :  { %682 = vbcast.lane.b32.xlu0 %v676_v52, 264  ;;  %p2962_p4 = pnand %p2961_p3, %p2955_p0 }
  0x27   :  { %693 = vbcast.lane.b32.xlu0 %v687_v55, 264 }
  0x2b   :  { %704 = vbcast.lane.b32.xlu0 %v698_v57, 264 }
  0x2f   :  { %715 = vbcast.lane.b32.xlu0 %v709_v59, 264 }
  0x33   :  { %726 = vbcast.lane.b32.xlu0 %v720_v61, 264 }
  0x37   :  { %737 = vbcast.lane.b32.xlu0 %v731_v63, 264 }
  0x77   :  { %v122_v9 = vpop.permute.xlu0 %121 }
  0x78   :  { %2667 = vmatmul.mubr.msk.bf16.vlgmr.msra.gmra.mrb[4].mxu1 %vm135_vm2, %v122_v9 }
  0x79   :  { %2674 = vmatprep.mubr.msk.bf16.mxu1 %vm135_vm2, %v3080_v29  ;;  %2671 = vmatpush3.bf16.msra.mxu1 %v2796_v27 }
  0x7a   :  { %2672 = vmatprep.subr.bf16.mxu1 %v2797_v28 }
  0x7d   :  { %2673 = vmatpush3.bf16.msra.mxu1 %v2797_v28 }
  0x7e   :  { %2716 = vmatprep.subr.bf16.mxu1 %v2978_v1 }
  0x80   :  { %2675 = vmatmul.mubr.msk.bf16.vlgmr.msra.gmra.mrb[8].mxu1 %vm135_vm2, %v2799_v31  ;;  %v2982_v31 = vmov 1966171168  }
  0x81   :  { %2678 = vmatprep.mubr.msk.bf16.mxu1 %vm135_vm2, %v2800_v32  ;;  %2717 = vmatpush3.bf16.msra.mxu1 %v2801_v33  ;;  %v472_v32 = vunpack.c.l.s4 %v2982_v31 }
  0x82   :  { %2728 = vmatprep.subr.bf16.mxu1 %v2978_v1 }
  0x88   :  { %2679 = vmatmul.mubr.msk.bf16.gmra.mrb[12].mxu1 %vm135_vm2, %v2801_v33 }
  0x89   :  { %2682 = vmatprep.mubr.msk.bf16.mxu1 %vm135_vm2, %v2804_v46 }
  0x90   :  { %2683 = vmatmul.mubr.msk.bf16.gmra.mrb[16].mxu1 %vm135_vm2, %v2805_v47 }
  0x91   :  { %2686 = vmatprep.mubr.msk.bf16.mxu1 %vm135_vm2, %v2806_v48 }
  0x98   :  { %2687 = vmatmul.mubr.msk.bf16.gmra.mrb[20].mxu1 %vm135_vm2, %v2807_v51 }
  0x99   :  { %2718 = vmatprep.mubr.msk.bf16.mxu1 %vm2979_vm0, %v2978_v1  ;;  %v207_v6 = vpop.permute.xlu0 %206 }
  0x9a   :  { %vm208_vm4 = vcmp.eq.s32.totalorder %v207_v6, 1 }
  0xe4   :  { %v106_v19 = vpop.f32.mrb[0].mxu1 }
  0xe5   :  { %v3068_v20 = vadd.f32 %v106_v19, %v43_v18  ;;  %v2660_v21 = vpop.f32.mrb[1].mxu1 }
  0xe6   :  { %v109_v22 = vpop.f32.mrb[2].mxu1 }
  0xe7   :  { %v2542_v23 = vmul.f32 -1.442695, %v3068_v20  ;;  %v2661_v24 = vpop.f32.mrb[3].mxu1 }
  0xe9   :  { %2822 = vpow2.f32 %v2542_v23 }
  0xf3   :  { %v2823_v25 = vpop.eup %2822 }
  0xf4   :  { %v183_v26 = vadd.f32 1.0, %v2823_v25 }
  0xf6   :  { %2824 = vrcp.f32 %v183_v26 }
 0x100   :  { %v2825_v34 = vpop.eup %2824 }
 0x101   :  { %187 = vrot.lane.b32.xlu1 %v2825_v34, %s2980_s27  ;;  %v473_v34 = vunpack.c.0.s8 %v472_v32 }
 0x14b   :  { %v173_v37 = vpop.f32.mrb[4].mxu1 }
 0x14c   :  { %v174_v38 = vadd.f32 %v173_v37, %v119_v36  ;;  %v2668_v39 = vpop.f32.mrb[5].mxu1  ;;  %v3183_v37 = vsub.s32 %v473_v34, %v3059_v12 }
 0x14d   :  { %v176_v40 = vpop.f32.mrb[6].mxu1 }
 0x14e   :  { %v2543_v41 = vmul.f32 -1.442695, %v174_v38  ;;  %v2669_v42 = vpop.f32.mrb[7].mxu1 }
 0x150   :  { %2826 = vpow2.f32 %v2543_v41 }
 0x153   :  { %v3165_v0 = vpop.f32.mrb[8].mxu1 }
 0x154   :  { %v341_v2 = vpop.f32.mrb[9].mxu1 }
 0x155   :  { %v3167_v3 = vpop.f32.mrb[10].mxu1 }
 0x156   :  { %v344_v4 = vpop.f32.mrb[11].mxu1 }
 0x15a   :  { %v2827_v43 = vpop.eup %2826 }
 0x15b   :  { %v195_v44 = vadd.f32 1.0, %v2827_v43  ;;  %v2680_v18 = vpop.f32.mrb[12].mxu1 }
 0x15c   :  { %v357_v19 = vpop.f32.mrb[13].mxu1 }
 0x15d   :  { %2828 = vrcp.f32 %v195_v44 }
 0x15e   :  { %2830 = vtanh.f32 %v3068_v20  ;;  %v2681_v20 = vpop.f32.mrb[14].mxu1 }
 0x15f   :  { %2832 = vtanh.f32 %v174_v38  ;;  %v360_v21 = vpop.f32.mrb[15].mxu1 }
 0x163   :  { %v2684_v22 = vpop.f32.mrb[16].mxu1 }
 0x164   :  { %v373_v23 = vpop.f32.mrb[17].mxu1 }
 0x165   :  { %v2685_v24 = vpop.f32.mrb[18].mxu1 }
 0x166   :  { %v376_v25 = vpop.f32.mrb[19].mxu1 }
 0x167   :  { %v2829_v54 = vpop.eup %2828 }
 0x168   :  { %199 = vrot.lane.b32.xlu1 %v2829_v54, %s2980_s27  ;;  %v2831_v7 = vpop.eup %2830 }
 0x169   :  { %v2833_v8 = vpop.eup %2832 }
 0x16b   :  { %v2688_v26 = vpop.f32.mrb[20].mxu1 }
 0x16c   :  { %671 = vbcast.lane.b32.xlu1 %v665_v50, 264  ;;  %v389_v27 = vpop.f32.mrb[21].mxu1 }
 0x16d   :  { %v2689_v28 = vpop.f32.mrb[22].mxu1 }
 0x16e   :  { %v392_v30 = vpop.f32.mrb[23].mxu1 }
 0x170   :  { %678 = vbcast.lane.b32.xlu1 %v676_v52, 256 }
 0x173   :  { %v188_v5 = vpop.permute.xlu1 %187 }
 0x174   :  { %689 = vbcast.lane.b32.xlu1 %v687_v55, 256  ;;  %v190_v11 = vmul.f32 %v2831_v7, %v188_v5  ;;  %v592_v55 = vunpack.c.l.bf16 %v591_v45 }
 0x178   :  { %700 = vbcast.lane.b32.xlu1 %v698_v57, 256 }
 0x17c   :  { %711 = vbcast.lane.b32.xlu1 %v709_v59, 256 }
 0x180   :  { %722 = vbcast.lane.b32.xlu1 %v720_v61, 256 }
 0x184   :  { %733 = vbcast.lane.b32.xlu1 %v731_v63, 256 }
 0x1da   :  { %v200_v9 = vpop.permute.xlu1 %199 }
 0x1db   :  { %v202_v13 = vmul.f32 %v2833_v8, %v200_v9 }
 0x1dd   :  { %v209_v14 = vsel %vm208_vm4, %v190_v11, %v202_v13 }
 0x1de   :  { %v3169_v15 = vpack.c.bf16 %v209_v14, %v209_v14  ;;  %v2493_v16 = vsel %vm135_vm2, %v209_v14, 0.0 }
 0x1df   :  { %2494 = vst [vmem:[#allocation2 + $0x8] sm:$0xff] %v2493_v16 }
 0x1e0   :  { %2695 = vmatmul.mubr.msk.bf16.vlgmr.msra.gmra.mrb[0].mxu0 %vm135_vm2, %v3169_v15 }
 0x1e1   :  { %2699 = vmatpush3.bf16.msra.mxu0 %v3080_v29  ;;  %2700 = vmatprep.mubr.msk.bf16.mxu0 %vm2979_vm0, %v2978_v1  ;;  %v408_v29 = vld [vmem:[%s3762_s4 + $0x20] sm:$0x1] }
 0x1e2   :  { %2704 = vmatprep.subr.bf16.mxu0 %v2978_v1  ;;  %v409_v33 = vunpack.c.l.bf16 %v408_v29 }
 0x1e4   :  { %v413_v36 = vrot.slane %v409_v33, %v3065_v17 }
 0x2b3   :  { %v463_v38 = vpop.f32.mrb[0].mxu0 }
 0x2b4   :  { %v464_v39 = vadd.f32 %v463_v38, %v413_v36  ;;  %v2696_v40 = vpop.f32.mrb[1].mxu0 }
 0x2b5   :  { %v466_v41 = vpop.f32.mrb[2].mxu0 }
 0x2b6   :  { %v470_v42 = vcombine.high %v464_v39, %v464_v39  ;;  %v477_v43 = vrot.slane %v464_v39, %v3183_v37  ;;  %v2697_v44 = vpop.f32.mrb[3].mxu0 }
 0x2b8   :  { %v484_v46 = vrot.slane %v470_v42, %v3183_v37  ;;  %v485_v47 = vcombine.high %v477_v43, %v477_v43  ;;  %v493_v48 = vrot.slane %v477_v43, %v3183_v37 }
 0x2ba   :  { %v522_v50 = vrot.slane %v493_v48, %v3065_v17  ;;  %v507_v51 = vrot.slane %v485_v47, %v3183_v37  ;;  %v515_v52 = vcombine.high %v493_v48, %v493_v48  ;;  %v486_v54 = vcombine.high %v484_v46, %v484_v46 }
 0x2bb   :  { %v500_v57 = vrot.slane %v484_v46, %v3183_v37 }
 0x2bc   :  { %v559_v59 = vadd.f32 %v522_v50, %v341_v2  ;;  %v560_v61 = vadd.f32 %v522_v50, %v344_v4  ;;  %v517_v63 = vcombine.high %v507_v51, %v507_v51  ;;  %v526_v5 = vrot.slane %v507_v51, %v3065_v17 }
 0x2bd   :  { %v530_v6 = vrot.slane %v515_v52, %v3065_v17  ;;  %v514_v7 = vrot.slane %v486_v54, %v3183_v37  ;;  %v538_v8 = vrot.slane %v500_v57, %v3065_v17  ;;  %v516_v9 = vcombine.high %v500_v57, %v500_v57 }
 0x2be   :  { %2834 = vtanh.f32 %v559_v59  ;;  %v534_v11 = vrot.slane %v517_v63, %v3065_v17  ;;  %v561_v13 = vadd.f32 %v3165_v0, %v526_v5  ;;  %v562_v14 = vadd.f32 %v3167_v3, %v526_v5 }
 0x2bf   :  { %2836 = vtanh.f32 %v560_v61  ;;  %v563_v2 = vadd.f32 %v530_v6, %v357_v19  ;;  %v564_v4 = vadd.f32 %v530_v6, %v360_v21  ;;  %v542_v16 = vrot.slane %v514_v7, %v3065_v17 }
 0x2c0   :  { %v565_v29 = vadd.f32 %v2680_v18, %v534_v11  ;;  %2838 = vtanh.f32 %v561_v13  ;;  %v566_v31 = vadd.f32 %v2681_v20, %v534_v11  ;;  %v567_v32 = vadd.f32 %v538_v8, %v373_v23 }
 0x2c1   :  { %2840 = vtanh.f32 %v562_v14  ;;  %v569_v33 = vadd.f32 %v2684_v22, %v542_v16  ;;  %v570_v34 = vadd.f32 %v2685_v24, %v542_v16  ;;  %v568_v36 = vadd.f32 %v538_v8, %v376_v25 }
 0x2c2   :  { %v518_v38 = vcombine.high %v514_v7, %v514_v7  ;;  %v546_v39 = vrot.slane %v516_v9, %v3065_v17  ;;  %2842 = vtanh.f32 %v563_v2  ;;  %v3205_v19 = vrot.slane %v592_v55, %v3104_v35 }
 0x2c3   :  { %2844 = vtanh.f32 %v564_v4 }
 0x2c4   :  { %v550_v0 = vrot.slane %v518_v38, %v3065_v17  ;;  %v571_v3 = vadd.f32 %v546_v39, %v389_v27  ;;  %v572_v40 = vadd.f32 %v546_v39, %v392_v30  ;;  %2846 = vtanh.f32 %v567_v32 }
 0x2c5   :  { %2848 = vtanh.f32 %v568_v36 }
 0x2c6   :  { %v573_v18 = vadd.f32 %v2688_v26, %v550_v0  ;;  %v574_v21 = vadd.f32 %v2689_v28, %v550_v0  ;;  %2850 = vtanh.f32 %v566_v31 }
 0x2c7   :  { %2852 = vtanh.f32 %v565_v29 }
 0x2c8   :  { %v2835_v20 = vpop.eup %2834  ;;  %2854 = vtanh.f32 %v570_v34 }
 0x2c9   :  { %v2837_v23 = vpop.eup %2836  ;;  %v597_v22 = vmul.f32 %v2835_v20, %v3205_v19  ;;  %2856 = vtanh.f32 %v569_v33  ;;  %v672_v20 = vpop.permute.xlu1 %671 }
 0x2ca   :  { %v2839_v24 = vpop.eup %2838  ;;  %v598_v25 = vmul.f32 %v2837_v23, %v3205_v19  ;;  %2858 = vtanh.f32 %v572_v40  ;;  %v668_v23 = vpop.permute.xlu0 %667 }
 0x2cb   :  { %v2841_v41 = vpop.eup %2840  ;;  %v613_v27 = vsel %vm135_vm2, %v597_v22, 0.0  ;;  %v599_v28 = vmul.f32 %v2839_v24, %v3205_v19  ;;  %2860 = vtanh.f32 %v571_v3 }
 0x2cc   :  { %614 = vadd.xlane.f32.xlu1 %v613_v27  ;;  %v616_v30 = vsel %vm135_vm2, %v598_v25, 0.0  ;;  %v600_v26 = vmul.f32 %v2841_v41, %v3205_v19  ;;  %v2843_v42 = vpop.eup %2842  ;;  %2862 = vtanh.f32 %v574_v21 }
 0x2cd   :  { %617 = vadd.xlane.f32.xlu0 %v616_v30  ;;  %v2845_v43 = vpop.eup %2844  ;;  %v619_v45 = vsel %vm135_vm2, %v599_v28, 0.0  ;;  %v601_v46 = vmul.f32 %v2843_v42, %v3205_v19  ;;  %2864 = vtanh.f32 %v573_v18  ;;  %v3240_v18 = vsub.s32 7, %v3059_v12  ;;  %v679_v22 = vpop.permute.xlu1 %678 }
 0x2ce   :  { %v622_v44 = vsel %vm135_vm2, %v600_v26, 0.0  ;;  %v602_v47 = vmul.f32 %v2845_v43, %v3205_v19  ;;  %v2847_v48 = vpop.eup %2846  ;;  %v683_v24 = vpop.permute.xlu0 %682 }
 0x2cf   :  { %v2849_v50 = vpop.eup %2848  ;;  %v625_v54 = vsel %vm135_vm2, %v601_v46, 0.0  ;;  %v605_v55 = vmul.f32 %v2847_v48, %v3205_v19  ;;  %v742_v21 = vrot.slane %v3124_v49, %v3240_v18 }
 0x2d0   :  { %623 = vadd.xlane.f32.xlu1 %v622_v44  ;;  %v628_v51 = vsel %vm135_vm2, %v602_v47, 0.0  ;;  %v2851_v52 = vpop.eup %2850  ;;  %v606_v57 = vmul.f32 %v2849_v50, %v3205_v19 }
 0x2d1   :  { %620 = vadd.xlane.f32.xlu0 %v619_v45  ;;  %v2853_v59 = vpop.eup %2852  ;;  %v604_v63 = vmul.f32 %v2851_v52, %v3205_v19  ;;  %v637_v6 = vsel %vm135_vm2, %v605_v55, 0.0 }
 0x2d2   :  { %v640_v61 = vsel %vm135_vm2, %v606_v57, 0.0  ;;  %v2855_v5 = vpop.eup %2854  ;;  %v603_v7 = vmul.f32 %v2853_v59, %v3205_v19  ;;  %v694_v25 = vpop.permute.xlu0 %693 }
 0x2d3   :  { %v2857_v8 = vpop.eup %2856  ;;  %v634_v9 = vsel %vm135_vm2, %v604_v63, 0.0  ;;  %v608_v11 = vmul.f32 %v2855_v5, %v3205_v19 }
 0x2d4   :  { %629 = vadd.xlane.f32.xlu1 %v628_v51  ;;  %v2859_v13 = vpop.eup %2858  ;;  %v631_v14 = vsel %vm135_vm2, %v603_v7, 0.0  ;;  %v607_v2 = vmul.f32 %v2857_v8, %v3205_v19 }
 0x2d5   :  { %626 = vadd.xlane.f32.xlu0 %v625_v54  ;;  %v2861_v4 = vpop.eup %2860  ;;  %v646_v16 = vsel %vm135_vm2, %v608_v11, 0.0  ;;  %v610_v29 = vmul.f32 %v2859_v13, %v3205_v19 }
 0x2d6   :  { %v2863_v31 = vpop.eup %2862  ;;  %v643_v32 = vsel %vm135_vm2, %v607_v2, 0.0  ;;  %v609_v33 = vmul.f32 %v2861_v4, %v3205_v19  ;;  %v705_v27 = vpop.permute.xlu0 %704 }
 0x2d7   :  { %v2865_v34 = vpop.eup %2864  ;;  %v652_v36 = vsel %vm135_vm2, %v610_v29, 0.0  ;;  %v612_v38 = vmul.f32 %v2863_v31, %v3205_v19 }
 0x2d8   :  { %641 = vadd.xlane.f32.xlu1 %v640_v61  ;;  %v649_v39 = vsel %vm135_vm2, %v609_v33, 0.0  ;;  %v611_v0 = vmul.f32 %v2865_v34, %v3205_v19  ;;  %v690_v19 = vpop.permute.xlu1 %689 }
 0x2d9   :  { %638 = vadd.xlane.f32.xlu0 %v637_v6  ;;  %v658_v3 = vsel %vm135_vm2, %v612_v38, 0.0 }
 0x2da   :  { %v655_v40 = vsel %vm135_vm2, %v611_v0, 0.0  ;;  %v716_v26 = vpop.permute.xlu0 %715 }
 0x2dc   :  { %635 = vadd.xlane.f32.xlu1 %v634_v9  ;;  %v701_v41 = vpop.permute.xlu1 %700 }
 0x2dd   :  { %632 = vadd.xlane.f32.xlu0 %v631_v14 }
 0x2de   :  { %v727_v42 = vpop.permute.xlu0 %726 }
 0x2e0   :  { %647 = vadd.xlane.f32.xlu1 %v646_v16  ;;  %v712_v30 = vpop.permute.xlu1 %711 }
 0x2e1   :  { %644 = vadd.xlane.f32.xlu0 %v643_v32 }
 0x2e2   :  { %v738_v44 = vpop.permute.xlu0 %737 }
 0x2e4   :  { %653 = vadd.xlane.f32.xlu1 %v652_v36  ;;  %v723_v28 = vpop.permute.xlu1 %722 }
 0x2e5   :  { %650 = vadd.xlane.f32.xlu0 %v649_v39 }
 0x2e8   :  { %659 = vadd.xlane.f32.xlu1 %v658_v3  ;;  %v734_v43 = vpop.permute.xlu1 %733 }
 0x2e9   :  { %656 = vadd.xlane.f32.xlu0 %v655_v40 }
 0x2f9   :  { %744 = vbcast.lane.b32.xlu1 %v742_v21, 256 }
 0x2ff   :  { %748 = vbcast.lane.b32.xlu0 %v742_v21, 264 }
 0x359   :  { %v615_v45 = vpop.xlane.xlu1 %614 }
 0x35a   :  { %v3244_v46 = vadd.f32 %v668_v23, %v615_v45  ;;  %v618_v49 = vpop.xlane.xlu0 %617 }
 0x35b   :  { %v3246_v47 = vadd.f32 %v672_v20, %v618_v49 }
 0x35c   :  { %799 = vperm.xlu1 %2789, %v3244_v46  }
 0x35d   :  { %802 = vperm.xlu0 %2788, %v3246_v47   ;;  %v624_v48 = vpop.xlane.xlu1 %623 }
 0x35e   :  { %v3250_v50 = vadd.f32 %v683_v24, %v624_v48  ;;  %v621_v51 = vpop.xlane.xlu0 %620  ;;  %v3293_v24 = vand.u32 127, %v40_v10 }
 0x35f   :  { %v3252_v52 = vadd.f32 %v679_v22, %v621_v51 }
 0x361   :  { %808 = vperm.xlu0 %2788, %v3250_v50   ;;  %805 = vperm.xlu1 %2789, %v3252_v52   ;;  %v630_v54 = vpop.xlane.xlu1 %629 }
 0x362   :  { %v627_v55 = vpop.xlane.xlu0 %626  ;;  %v3256_v57 = vadd.f32 %v694_v25, %v630_v54 }
 0x363   :  { %v3258_v59 = vadd.f32 %v690_v19, %v627_v55 }
 0x365   :  { %814 = vperm.xlu0 %2788, %v3256_v57   ;;  %811 = vperm.xlu1 %2789, %v3258_v59   ;;  %v642_v61 = vpop.xlane.xlu1 %641 }
 0x366   :  { %v639_v63 = vpop.xlane.xlu0 %638  ;;  %v3262_v5 = vadd.f32 %v716_v26, %v642_v61  ;;  %v3298_v26 = vsub.s32 %v3293_v24, %v3059_v12 }
 0x367   :  { %v3264_v6 = vadd.f32 %v712_v30, %v639_v63 }
 0x369   :  { %826 = vperm.xlu0 %2788, %v3262_v5   ;;  %823 = vperm.xlu1 %2789, %v3264_v6   ;;  %v636_v7 = vpop.xlane.xlu1 %635 }
 0x36a   :  { %v633_v8 = vpop.xlane.xlu0 %632  ;;  %v3268_v9 = vadd.f32 %v705_v27, %v636_v7 }
 0x36b   :  { %v3270_v11 = vadd.f32 %v701_v41, %v633_v8  ;;  %v852_v41 = vadd.s32 4294967288, %v3293_v24 }
 0x36d   :  { %820 = vperm.xlu0 %2788, %v3268_v9   ;;  %817 = vperm.xlu1 %2789, %v3270_v11   ;;  %v648_v13 = vpop.xlane.xlu1 %647 }
 0x36e   :  { %v645_v14 = vpop.xlane.xlu0 %644  ;;  %v3274_v2 = vadd.f32 %v727_v42, %v648_v13 }
 0x36f   :  { %v3276_v4 = vadd.f32 %v723_v28, %v645_v14  ;;  %v3301_v28 = vsub.s32 %v852_v41, %v3059_v12 }
 0x371   :  { %832 = vperm.xlu0 %2788, %v3274_v2   ;;  %829 = vperm.xlu1 %2789, %v3276_v4   ;;  %v654_v16 = vpop.xlane.xlu1 %653 }
 0x372   :  { %v651_v29 = vpop.xlane.xlu0 %650  ;;  %v3280_v31 = vadd.f32 %v738_v44, %v654_v16 }
 0x373   :  { %v3282_v32 = vadd.f32 %v734_v43, %v651_v29 }
 0x375   :  { %835 = vperm.xlu1 %2789, %v3282_v32   ;;  %838 = vperm.xlu0 %2788, %v3280_v31   ;;  %v660_v33 = vpop.xlane.xlu1 %659 }
 0x376   :  { %v657_v34 = vpop.xlane.xlu0 %656 }
 0x379   :  { %v745_v36 = vpop.permute.xlu1 %744 }
 0x37a   :  { %v749_v38 = vpop.permute.xlu0 %748  ;;  %v3286_v39 = vadd.f32 %v745_v36, %v657_v34 }
 0x37b   :  { %v3288_v0 = vadd.f32 %v749_v38, %v660_v33 }
 0x37c   :  { %841 = vperm.xlu1 %2789, %v3286_v39  }
 0x37d   :  { %844 = vperm.xlu0 %2788, %v3288_v0  }
 0x3db   :  { %v800_v3 = vpop.permute.xlu1 %799 }
 0x3dc   :  { %v803_v40 = vpop.permute.xlu0 %802  ;;  %v851_v49 = vrot.slane %v800_v3, %v3298_v26 }
 0x3dd   :  { %v856_v45 = vrot.slane %v803_v40, %v3301_v28 }
 0x3df   :  { %v858_v8 = vsel %vm857_vm5, %v856_v45, %v851_v49 }
 0x3e0   :  { %v809_v21 = vpop.permute.xlu0 %808  ;;  %v806_v20 = vpop.permute.xlu1 %805 }
 0x3e1   :  { %v866_v42 = vrot.slane %v809_v21, %v3301_v28  ;;  %v862_v43 = vrot.slane %v806_v20, %v3298_v26 }
 0x3e3   :  { %v867_v61 = vsel %vm857_vm5, %v866_v42, %v862_v43 }
 0x3e4   :  { %v815_v23 = vpop.permute.xlu0 %814  ;;  %v812_v22 = vpop.permute.xlu1 %811  ;;  %v923_v14 = vsel %vm922_vm6, %v867_v61, %v858_v8 }
 0x3e5   :  { %v875_v48 = vrot.slane %v815_v23, %v3301_v28  ;;  %v871_v51 = vrot.slane %v812_v22, %v3298_v26 }
 0x3e7   :  { %v876_v13 = vsel %vm857_vm5, %v875_v48, %v871_v51 }
 0x3e8   :  { %v827_v19 = vpop.permute.xlu0 %826  ;;  %v824_v25 = vpop.permute.xlu1 %823  ;;  %v925_v40 = vsel %vm924_vm7, %v876_v13, %v923_v14 }
 0x3e9   :  { %v893_v34 = vrot.slane %v827_v19, %v3301_v28  ;;  %v889_v36 = vrot.slane %v824_v25, %v3298_v26 }
 0x3eb   :  { %v894_v22 = vsel %vm857_vm5, %v893_v34, %v889_v36 }
 0x3ec   :  { %v821_v27 = vpop.permute.xlu0 %820  ;;  %v818_v30 = vpop.permute.xlu1 %817 }
 0x3ed   :  { %v884_v54 = vrot.slane %v821_v27, %v3301_v28  ;;  %v880_v55 = vrot.slane %v818_v30, %v3298_v26 }
 0x3ef   :  { %v885_v16 = vsel %vm857_vm5, %v884_v54, %v880_v55 }
 0x3f0   :  { %v833_v44 = vpop.permute.xlu0 %832  ;;  %v830_v10 = vpop.permute.xlu1 %829  ;;  %v927_v21 = vsel %vm926_vm8, %v885_v16, %v925_v40 }
 0x3f1   :  { %v902_v29 = vrot.slane %v833_v44, %v3301_v28  ;;  %v898_v33 = vrot.slane %v830_v10, %v3298_v26  ;;  %v929_v30 = vsel %vm928_vm9, %v894_v22, %v927_v21 }
 0x3f3   :  { %v903_v20 = vsel %vm857_vm5, %v902_v29, %v898_v33 }
 0x3f4   :  { %v839_v63 = vpop.permute.xlu0 %838  ;;  %v836_v7 = vpop.permute.xlu1 %835  ;;  %v931_v42 = vsel %vm930_vm10, %v903_v20, %v929_v30 }
 0x3f5   :  { %v911_v38 = vrot.slane %v839_v63, %v3301_v28  ;;  %v907_v3 = vrot.slane %v836_v7, %v3298_v26 }
 0x3f7   :  { %v912_v41 = vsel %vm857_vm5, %v911_v38, %v907_v3 }
 0x3f8   :  { %v933_v44 = vsel %vm932_vm11, %v912_v41, %v931_v42 }
 0x3fb   :  { %v842_v23 = vpop.permute.xlu1 %841 }
 0x3fc   :  { %v845_v19 = vpop.permute.xlu0 %844  ;;  %v916_v25 = vrot.slane %v842_v23, %v3298_v26 }
 0x3fd   :  { %v920_v27 = vrot.slane %v845_v19, %v3301_v28 }
 0x3ff   :  { %v921_v43 = vsel %vm857_vm5, %v920_v27, %v916_v25 }
 0x400   :  { %v935_v10 = vsel %vm934_vm12, %v921_v43, %v933_v44 }
 0x401   :  { %v938_v45 = vsel %vm937_vm13, %v935_v10, -inf }
 0x402   :  { %939 = vmax.xlane.f32.xlu1 %v938_v45 }
 0x48f   :  { %v940_v49 = vpop.xlane.xlu1 %939 }
 0x490   :  { %v945_v48 = vrot.slane %v940_v49, %v3065_v17  ;;  %v949_v54 = vrot.slane %v940_v49, %v3104_v35  ;;  %v961_v61 = vrot.slane %v940_v49, %v3150_v58  ;;  %v3343_v14 = vrot.slane %v940_v49, %v3240_v18 }
 0x491   :  { %v953_v16 = vrot.slane %v940_v49, %v3136_v53  ;;  %v957_v38 = vrot.slane %v940_v49, %v3143_v56  ;;  %v969_v43 = vrot.slane %v940_v49, %v3160_v62 }
 0x492   :  { %v982_v51 = vsub.f32 %v3244_v46, %v945_v48  ;;  %v983_v55 = vsub.f32 %v3246_v47, %v945_v48  ;;  %v984_v7 = vsub.f32 %v3252_v52, %v949_v54  ;;  %v991_v13 = vsub.f32 %v3262_v5, %v961_v61 }
 0x493   :  { %v985_v46 = vsub.f32 %v3250_v50, %v949_v54  ;;  %v996_v47 = vsub.f32 %v3286_v39, %v3343_v14  ;;  %v986_v34 = vsub.f32 %v3258_v59, %v953_v16  ;;  %v987_v50 = vsub.f32 %v3256_v57, %v953_v16 }
 0x494   :  { %v998_v63 = vmul.f32 1.442695, %v982_v51  ;;  %v1000_v8 = vmul.f32 1.442695, %v983_v55  ;;  %v1002_v29 = vmul.f32 1.442695, %v984_v7  ;;  %v988_v59 = vsub.f32 %v3270_v11, %v957_v38 }
 0x495   :  { %v1016_v33 = vmul.f32 1.442695, %v991_v13  ;;  %v1004_v52 = vmul.f32 1.442695, %v985_v46  ;;  %v1026_v5 = vmul.f32 1.442695, %v996_v47  ;;  %v989_v23 = vsub.f32 %v3268_v9, %v957_v38 }
 0x496   :  { %2866 = vpow2.f32 %v998_v63  ;;  %v1006_v3 = vmul.f32 1.442695, %v986_v34  ;;  %v1008_v39 = vmul.f32 1.442695, %v987_v50  ;;  %v1010_v57 = vmul.f32 1.442695, %v988_v59 }
 0x497   :  { %2868 = vpow2.f32 %v1000_v8  ;;  %v965_v11 = vrot.slane %v940_v49, %v3155_v60  ;;  %v990_v19 = vsub.f32 %v3264_v6, %v961_v61  ;;  %v1012_v25 = vmul.f32 1.442695, %v989_v23 }
 0x498   :  { %2870 = vpow2.f32 %v1002_v29  ;;  %v994_v45 = vsub.f32 %v3282_v32, %v969_v43  ;;  %v995_v51 = vsub.f32 %v3280_v31, %v969_v43 }
 0x499   :  { %2872 = vpow2.f32 %v1016_v33  ;;  %v992_v9 = vsub.f32 %v3276_v4, %v965_v11  ;;  %v1014_v30 = vmul.f32 1.442695, %v990_v19  ;;  %v993_v6 = vsub.f32 %v3274_v2, %v965_v11 }
 0x49a   :  { %2874 = vpow2.f32 %v1004_v52  ;;  %v1022_v49 = vmul.f32 1.442695, %v994_v45  ;;  %v997_v2 = vsub.f32 %v3288_v0, %v3343_v14  ;;  %v1024_v55 = vmul.f32 1.442695, %v995_v51 }
 0x49b   :  { %2876 = vpow2.f32 %v1026_v5  ;;  %v1018_v44 = vmul.f32 1.442695, %v992_v9  ;;  %v1020_v4 = vmul.f32 1.442695, %v993_v6 }
 0x49c   :  { %2878 = vpow2.f32 %v1006_v3  ;;  %v1028_v61 = vmul.f32 1.442695, %v997_v2 }
 0x49d   :  { %2880 = vpow2.f32 %v1008_v39 }
 0x49e   :  { %2882 = vpow2.f32 %v1010_v57 }
 0x49f   :  { %2884 = vpow2.f32 %v1012_v25 }
 0x4a0   :  { %v3350_v36 = vpop.eup %2866  ;;  %2886 = vpow2.f32 %v1014_v30 }
 0x4a1   :  { %1047 = vperm.xlu0 %2788, %v3350_v36   ;;  %v3355_v40 = vpop.eup %2868  ;;  %2888 = vpow2.f32 %v1018_v44 }
 0x4a2   :  { %v3359_v21 = vpop.eup %2870  ;;  %2890 = vpow2.f32 %v1020_v4 }
 0x4a3   :  { %v3361_v20 = vpop.eup %2872  ;;  %2892 = vpow2.f32 %v1022_v49 }
 0x4a4   :  { %1074 = vperm.xlu1 %2789, %v3361_v20   ;;  %v3366_v22 = vpop.eup %2874  ;;  %2894 = vpow2.f32 %v1024_v55 }
 0x4a5   :  { %1050 = vperm.xlu0 %2788, %v3355_v40   ;;  %v3369_v41 = vpop.eup %2876  ;;  %2896 = vpow2.f32 %v1028_v61 }
 0x4a6   :  { %v3374_v27 = vpop.eup %2878 }
 0x4a7   :  { %v3378_v42 = vpop.eup %2880 }
 0x4a8   :  { %1089 = vperm.xlu1 %2789, %v3369_v41   ;;  %v3383_v10 = vpop.eup %2882 }
 0x4a9   :  { %1053 = vperm.xlu0 %2788, %v3359_v21   ;;  %v3387_v48 = vpop.eup %2884 }
 0x4aa   :  { %v3391_v54 = vpop.eup %2886 }
 0x4ab   :  { %v3396_v32 = vpop.eup %2888 }
 0x4ac   :  { %v3399_v63 = vpop.eup %2890 }
 0x4ad   :  { %1056 = vperm.xlu0 %2788, %v3366_v22   ;;  %v3402_v31 = vpop.eup %2892 }
 0x4ae   :  { %v3405_v7 = vpop.eup %2894 }
 0x4af   :  { %v3408_v0 = vpop.eup %2896 }
 0x4b1   :  { %1059 = vperm.xlu0 %2788, %v3374_v27  }
 0x4b5   :  { %1062 = vperm.xlu0 %2788, %v3378_v42  }
 0x4b9   :  { %1065 = vperm.xlu0 %2788, %v3383_v10  }
 0x4bd   :  { %1068 = vperm.xlu0 %2788, %v3387_v48  }
 0x4c1   :  { %1071 = vperm.xlu0 %2788, %v3391_v54  }
 0x4c5   :  { %1077 = vperm.xlu0 %2788, %v3396_v32  }
 0x4c9   :  { %1080 = vperm.xlu0 %2788, %v3399_v63  }
 0x4cd   :  { %1083 = vperm.xlu0 %2788, %v3402_v31  }
 0x4d1   :  { %1086 = vperm.xlu0 %2788, %v3405_v7  }
 0x4d5   :  { %1092 = vperm.xlu0 %2788, %v3408_v0  }
 0x520   :  { %v1048_v8 = vpop.permute.xlu0 %1047 }
 0x521   :  { %v1097_v25 = vrot.slane %v1048_v8, %v3298_v26 }
 0x523   :  { %v1075_v50 = vpop.permute.xlu1 %1074 }
 0x524   :  { %v1051_v13 = vpop.permute.xlu0 %1050  ;;  %v1137_v6 = vrot.slane %v1075_v50, %v3301_v28 }
 0x525   :  { %v1101_v39 = vrot.slane %v1051_v13, %v3301_v28 }
 0x527   :  { %v1102_v4 = vsel %vm857_vm5, %v1101_v39, %v1097_v25  ;;  %v1090_v55 = vpop.permute.xlu1 %1089 }
 0x528   :  { %v1054_v14 = vpop.permute.xlu0 %1053 }
 0x529   :  { %v1106_v23 = vrot.slane %v1054_v14, %v3298_v26 }
 0x52c   :  { %v1057_v16 = vpop.permute.xlu0 %1056 }
 0x52d   :  { %v1110_v38 = vrot.slane %v1057_v16, %v3301_v28 }
 0x52f   :  { %v1111_v9 = vsel %vm857_vm5, %v1110_v38, %v1106_v23 }
 0x530   :  { %v1060_v46 = vpop.permute.xlu0 %1059  ;;  %v1166_v61 = vsel %vm922_vm6, %v1111_v9, %v1102_v4 }
 0x531   :  { %v1115_v11 = vrot.slane %v1060_v46, %v3298_v26 }
 0x534   :  { %v1063_v29 = vpop.permute.xlu0 %1062 }
 0x535   :  { %v1119_v3 = vrot.slane %v1063_v29, %v3301_v28 }
 0x537   :  { %v1120_v44 = vsel %vm857_vm5, %v1119_v3, %v1115_v11 }
 0x538   :  { %v1066_v33 = vpop.permute.xlu0 %1065  ;;  %v1167_v14 = vsel %vm924_vm7, %v1120_v44, %v1166_v61 }
 0x539   :  { %v1124_v30 = vrot.slane %v1066_v33, %v3298_v26 }
 0x53c   :  { %v1069_v47 = vpop.permute.xlu0 %1068 }
 0x53d   :  { %v1128_v57 = vrot.slane %v1069_v47, %v3301_v28  ;;  %v1160_v47 = vrot.slane %v1090_v55, %v3298_v26 }
 0x53f   :  { %v1129_v51 = vsel %vm857_vm5, %v1128_v57, %v1124_v30 }
 0x540   :  { %v1072_v34 = vpop.permute.xlu0 %1071  ;;  %v1168_v46 = vsel %vm926_vm8, %v1129_v51, %v1167_v14 }
 0x541   :  { %v1133_v19 = vrot.slane %v1072_v34, %v3298_v26 }
 0x543   :  { %v1138_v8 = vsel %vm857_vm5, %v1137_v6, %v1133_v19 }
 0x544   :  { %v1078_v52 = vpop.permute.xlu0 %1077  ;;  %v1169_v34 = vsel %vm928_vm9, %v1138_v8, %v1168_v46 }
 0x545   :  { %v1142_v49 = vrot.slane %v1078_v52, %v3298_v26 }
 0x548   :  { %v1081_v5 = vpop.permute.xlu0 %1080 }
 0x549   :  { %v1146_v43 = vrot.slane %v1081_v5, %v3301_v28 }
 0x54b   :  { %v1147_v16 = vsel %vm857_vm5, %v1146_v43, %v1142_v49 }
 0x54c   :  { %v1084_v59 = vpop.permute.xlu0 %1083  ;;  %v1170_v5 = vsel %vm930_vm10, %v1147_v16, %v1169_v34 }
 0x54d   :  { %v1151_v13 = vrot.slane %v1084_v59, %v3298_v26 }
 0x550   :  { %v1087_v45 = vpop.permute.xlu0 %1086 }
 0x551   :  { %v1155_v2 = vrot.slane %v1087_v45, %v3301_v28 }
 0x553   :  { %v1156_v29 = vsel %vm857_vm5, %v1155_v2, %v1151_v13 }
 0x554   :  { %v1093_v33 = vpop.permute.xlu0 %1092  ;;  %v1171_v50 = vsel %vm932_vm11, %v1156_v29, %v1170_v5 }
 0x555   :  { %v1164_v52 = vrot.slane %v1093_v33, %v3301_v28 }
 0x557   :  { %v1165_v38 = vsel %vm857_vm5, %v1164_v52, %v1160_v47 }
 0x558   :  { %v1172_v3 = vsel %vm934_vm12, %v1165_v38, %v1171_v50 }
 0x559   :  { %v1174_v59 = vsel %vm937_vm13, %v1172_v3, 0.0 }
 0x55a   :  { %1175 = vadd.xlane.f32.xlu1 %v1174_v59 }
 0x5e7   :  { %v1176_v39 = vpop.xlane.xlu1 %1175 }
 0x5e8   :  { %2898 = vrcp.f32 %v1176_v39 }
 0x5f2   :  { %v2899_v23 = vpop.eup %2898 }
 0x5f3   :  { %v1198_v57 = vrot.slane %v2899_v23, %v3150_v58  ;;  %v1182_v11 = vrot.slane %v2899_v23, %v3065_v17  ;;  %v1210_v19 = vrot.slane %v2899_v23, %v3240_v18  ;;  %v1186_v25 = vrot.slane %v2899_v23, %v3104_v35 }
 0x5f4   :  { %v1194_v13 = vrot.slane %v2899_v23, %v3143_v56 }
 0x5f5   :  { %v1227_v9 = vmul.f32 %v3391_v54, %v1198_v57  ;;  %v1228_v30 = vmul.f32 %v3361_v20, %v1198_v57  ;;  %v1219_v43 = vmul.f32 %v3350_v36, %v1182_v11  ;;  %v1220_v6 = vmul.f32 %v3355_v40, %v1182_v11  ;;  %v2948_v57 = vld [vmem:[%s3759_s1 + $0x8] sm:$0xff]  }
 0x5f6   :  { %v1233_v44 = vmul.f32 %v3369_v41, %v1210_v19  ;;  %v1234_v45 = vmul.f32 %v3408_v0, %v1210_v19  ;;  %v1221_v51 = vmul.f32 %v3359_v21, %v1186_v25  ;;  %v1222_v55 = vmul.f32 %v3366_v22, %v1186_v25 }
 0x5f7   :  { %v1239_v4 = vpack.c.bf16 %v1228_v30, %v1227_v9  ;;  %v1235_v58 = vpack.c.bf16 %v1220_v6, %v1219_v43  ;;  %v1190_v40 = vrot.slane %v2899_v23, %v3136_v53  ;;  %v1225_v14 = vmul.f32 %v3383_v10, %v1194_v13  ;;  %v2949_v6 = vld [vmem:[%s3759_s1 + $0x10] sm:$0xff]  }
 0x5f8   :  { %v1242_v2 = vpack.c.bf16 %v1234_v45, %v1233_v44  ;;  %v1236_v36 = vpack.c.bf16 %v1222_v55, %v1221_v51  ;;  %v1226_v16 = vmul.f32 %v3387_v48, %v1194_v13  ;;  %v1206_v10 = vrot.slane %v2899_v23, %v3160_v62 }
 0x5f9   :  { %v1497_v49 = vunpack.c.h.b16 %v1239_v4  ;;  %v1244_v18 = vunpack.c.l.b16 %v1235_v58  ;;  %v1245_v54 = vunpack.c.h.b16 %v1235_v58  ;;  %v1223_v0 = vmul.f32 %v3374_v27, %v1190_v40 }
 0x5fa   :  { %v1685_v20 = vunpack.c.l.b16 %v1242_v2  ;;  %v1307_v41 = vunpack.c.l.b16 %v1236_v36  ;;  %v1224_v61 = vmul.f32 %v3378_v42, %v1190_v40  ;;  %v1308_v21 = vunpack.c.h.b16 %v1236_v36 }
 0x5fb   :  { %1502 = vperm.xlu1 %2789, %v1497_v49   ;;  %1247 = vperm.xlu0 %2788, %v1244_v18   ;;  %v1238_v46 = vpack.c.bf16 %v1226_v16, %v1225_v14  ;;  %v1202_v27 = vrot.slane %v2899_v23, %v3155_v60  ;;  %v1496_v56 = vunpack.c.l.b16 %v1239_v4  ;;  %v1231_v52 = vmul.f32 %v3402_v31, %v1206_v10  ;;  %v2950_v18 = vld [vmem:[%s3759_s1 + $0x20] sm:$0xff]   ;;  %v2952_v14 = vld [vmem:[%s3759_s1 + $0x30] sm:$0xff]  }
 0x5fc   :  { %v1237_v8 = vpack.c.bf16 %v1224_v61, %v1223_v0  ;;  %v1232_v5 = vmul.f32 %v3405_v7, %v1206_v10 }
 0x5fd   :  { %v1433_v29 = vunpack.c.l.b16 %v1238_v46  ;;  %v1434_v42 = vunpack.c.h.b16 %v1238_v46  ;;  %v1229_v33 = vmul.f32 %v3396_v32, %v1202_v27  ;;  %v1230_v47 = vmul.f32 %v3399_v63, %v1202_v27 }
 0x5fe   :  { %v1370_v22 = vunpack.c.l.b16 %v1237_v8  ;;  %v1371_v53 = vunpack.c.h.b16 %v1237_v8  ;;  %v1241_v60 = vpack.c.bf16 %v1232_v5, %v1231_v52  ;;  %v1686_v63 = vunpack.c.h.b16 %v1242_v2  ;;  %v2951_v8 = vld [vmem:[%s3759_s1 + $0x28] sm:$0xff]  }
 0x5ff   :  { %1688 = vperm.xlu1 %2789, %v1685_v20   ;;  %1250 = vperm.xlu0 %2788, %v1245_v54   ;;  %v1240_v34 = vpack.c.bf16 %v1230_v47, %v1229_v33  ;;  %v2953_v33 = vld [vmem:[%s3759_s1 + $0x38] sm:$0xff]  }
 0x600   :  { %v1622_v50 = vunpack.c.l.b16 %v1241_v60  ;;  %v1623_v32 = vunpack.c.h.b16 %v1241_v60 }
 0x601   :  { %v1559_v48 = vunpack.c.l.b16 %v1240_v34  ;;  %v1560_v38 = vunpack.c.h.b16 %v1240_v34 }
 0x603   :  { %1310 = vperm.xlu0 %2788, %v1307_v41  }
 0x607   :  { %1313 = vperm.xlu0 %2788, %v1308_v21  }
 0x60b   :  { %1373 = vperm.xlu0 %2788, %v1370_v22  }
 0x60f   :  { %1376 = vperm.xlu0 %2788, %v1371_v53  }
 0x613   :  { %1436 = vperm.xlu0 %2788, %v1433_v29  }
 0x617   :  { %1439 = vperm.xlu0 %2788, %v1434_v42  }
 0x61b   :  { %1499 = vperm.xlu0 %2788, %v1496_v56  }
 0x61f   :  { %1562 = vperm.xlu0 %2788, %v1559_v48  }
 0x623   :  { %1565 = vperm.xlu0 %2788, %v1560_v38  }
 0x627   :  { %1625 = vperm.xlu0 %2788, %v1622_v50  }
 0x62b   :  { %1628 = vperm.xlu0 %2788, %v1623_v32   ;;  %v2808_v32 = vld [vmem:[%s3763_s5] sm:$0xff]  }
 0x62f   :  { %1691 = vperm.xlu0 %2788, %v1686_v63  }
 0x67a   :  { %v1248_v3 = vpop.permute.xlu0 %1247  ;;  %v1503_v54 = vpop.permute.xlu1 %1502 }
 0x67b   :  { %v1255_v62 = vrot.slane %v1248_v3, %v3298_v26  ;;  %v1511_v0 = vrot.slane %v1503_v54, %v3301_v28  ;;  %v2809_v3 = vld [vmem:[%s3763_s5 + $0x8] sm:$0xff]  }
 0x67e   :  { %v1251_v59 = vpop.permute.xlu0 %1250  ;;  %v1689_v10 = vpop.permute.xlu1 %1688 }
 0x67f   :  { %v1259_v39 = vrot.slane %v1251_v59, %v3301_v28  ;;  %v1696_v38 = vrot.slane %v1689_v10, %v3298_v26  ;;  %v2810_v59 = vld [vmem:[%s3763_s5 + $0x10] sm:$0xff]  }
 0x681   :  { %v1260_v31 = vsel %vm857_vm5, %v1259_v39, %v1255_v62  ;;  %v2811_v62 = vld [vmem:[%s3763_s5 + $0x18] sm:$0xff]   ;;  %v3558_v39 = vld [vmem:[%s3763_s5 + $0x20] sm:$0xff]  }
 0x682   :  { %v1261_v23 = vpack.c.b16 %v1260_v31, %v1260_v31  ;;  %v1311_v7 = vpop.permute.xlu0 %1310 }
 0x683   :  { %v1318_v19 = vrot.slane %v1311_v7, %v3298_v26 }
 0x684   :  { %2701 = vmatmul.mubr.msk.bf16.vlgmr.msra.gmra.mrb[4].mxu0 %vm937_vm13, %v1261_v23 }
 0x685   :  { %2705 = vmatpush3.bf16.msra.mxu0 %v2948_v57  ;;  %2706 = vmatprep.mubr.msk.bf16.mxu0 %vm2979_vm0, %v2978_v1 }
 0x686   :  { %v1314_v11 = vpop.permute.xlu0 %1313  ;;  %2710 = vmatprep.subr.bf16.mxu0 %v2978_v1 }
 0x687   :  { %v1322_v25 = vrot.slane %v1314_v11, %v3301_v28 }
 0x689   :  { %v1323_v9 = vsel %vm857_vm5, %v1322_v25, %v1318_v19 }
 0x68a   :  { %v1324_v30 = vpack.c.b16 %v1323_v9, %v1323_v9  ;;  %v1374_v43 = vpop.permute.xlu0 %1373 }
 0x68b   :  { %v1381_v45 = vrot.slane %v1374_v43, %v3298_v26 }
 0x68c   :  { %2707 = vmatmul.mubr.msk.bf16.vlgmr.msra.gmra.mrb[8].mxu0 %vm937_vm13, %v1324_v30 }
 0x68d   :  { %2711 = vmatpush3.bf16.msra.mxu0 %v2949_v6  ;;  %2712 = vmatprep.mubr.msk.bf16.mxu0 %vm2979_vm0, %v2978_v1 }
 0x68e   :  { %v1377_v44 = vpop.permute.xlu0 %1376  ;;  %2722 = vmatprep.subr.bf16.mxu0 %v2978_v1 }
 0x68f   :  { %v1385_v4 = vrot.slane %v1377_v44, %v3301_v28 }
 0x691   :  { %v1386_v58 = vsel %vm857_vm5, %v1385_v4, %v1381_v45 }
 0x692   :  { %v1387_v51 = vpack.c.b16 %v1386_v58, %v1386_v58  ;;  %v1437_v49 = vpop.permute.xlu0 %1436 }
 0x693   :  { %v1444_v55 = vrot.slane %v1437_v49, %v3298_v26 }
 0x694   :  { %2713 = vmatmul.mubr.msk.bf16.vlgmr.msra.gmra.mrb[12].mxu0 %vm937_vm13, %v1387_v51 }
 0x695   :  { %2723 = vmatpush3.bf16.msra.mxu0 %v2950_v18  ;;  %2724 = vmatprep.mubr.msk.bf16.mxu0 %vm2979_vm0, %v2978_v1 }
 0x696   :  { %v1440_v2 = vpop.permute.xlu0 %1439  ;;  %2734 = vmatprep.subr.bf16.mxu0 %v2978_v1 }
 0x697   :  { %v1448_v20 = vrot.slane %v1440_v2, %v3301_v28 }
 0x699   :  { %v1449_v36 = vsel %vm857_vm5, %v1448_v20, %v1444_v55 }
 0x69a   :  { %v1450_v40 = vpack.c.b16 %v1449_v36, %v1449_v36  ;;  %v1500_v41 = vpop.permute.xlu0 %1499 }
 0x69b   :  { %v1507_v61 = vrot.slane %v1500_v41, %v3298_v26 }
 0x69c   :  { %2719 = vmatmul.mubr.msk.bf16.vlgmr.msra.gmra.mrb[24].mxu1 %vm937_vm13, %v1450_v40 }
 0x69d   :  { %v1512_v21 = vsel %vm857_vm5, %v1511_v0, %v1507_v61  ;;  %2729 = vmatpush3.bf16.msra.mxu1 %v2951_v8  ;;  %2730 = vmatprep.mubr.msk.bf16.mxu1 %vm2979_vm0, %v2978_v1 }
 0x69e   :  { %v1513_v13 = vpack.c.b16 %v1512_v21, %v1512_v21  ;;  %v1563_v22 = vpop.permute.xlu0 %1562  ;;  %2740 = vmatprep.subr.bf16.mxu1 %v2978_v1 }
 0x69f   :  { %v1570_v53 = vrot.slane %v1563_v22, %v3298_v26 }
 0x6a0   :  { %2725 = vmatmul.mubr.msk.bf16.vlgmr.msra.gmra.mrb[16].mxu0 %vm937_vm13, %v1513_v13 }
 0x6a1   :  { %2735 = vmatpush3.bf16.msra.mxu0 %v2952_v14  ;;  %2736 = vmatprep.mubr.msk.bf16.mxu0 %vm2979_vm0, %v2978_v1 }
 0x6a2   :  { %v1566_v16 = vpop.permute.xlu0 %1565  ;;  %2746 = vmatprep.subr.bf16.mxu0 %v2978_v1 }
 0x6a3   :  { %v1574_v46 = vrot.slane %v1566_v16, %v3301_v28 }
 0x6a5   :  { %v1575_v29 = vsel %vm857_vm5, %v1574_v46, %v1570_v53 }
 0x6a6   :  { %v1576_v27 = vpack.c.b16 %v1575_v29, %v1575_v29  ;;  %v1626_v42 = vpop.permute.xlu0 %1625 }
 0x6a7   :  { %v1633_v56 = vrot.slane %v1626_v42, %v3298_v26 }
 0x6a8   :  { %2731 = vmatmul.mubr.msk.bf16.vlgmr.msra.gmra.mrb[28].mxu1 %vm937_vm13, %v1576_v27 }
 0x6a9   :  { %2741 = vmatpush3.bf16.msra.mxu1 %v2953_v33  ;;  %2742 = vmatprep.mubr.msk.bf16.mxu1 %vm2979_vm0, %v2978_v1 }
 0x6aa   :  { %v1629_v47 = vpop.permute.xlu0 %1628  ;;  %2754 = vmatprep.subr.bf16.mxu1 %v2978_v1 }
 0x6ab   :  { %v1637_v34 = vrot.slane %v1629_v47, %v3301_v28 }
 0x6ad   :  { %v1638_v48 = vsel %vm857_vm5, %v1637_v34, %v1633_v56 }
 0x6ae   :  { %v1639_v52 = vpack.c.b16 %v1638_v48, %v1638_v48  ;;  %v1692_v5 = vpop.permute.xlu0 %1691 }
 0x6af   :  { %v1700_v60 = vrot.slane %v1692_v5, %v3301_v28 }
 0x6b0   :  { %2737 = vmatmul.mubr.msk.bf16.vlgmr.msra.gmra.mrb[20].mxu0 %vm937_vm13, %v1639_v52 }
 0x6b1   :  { %v1701_v50 = vsel %vm857_vm5, %v1700_v60, %v1696_v38  ;;  %2750 = vmatprep.mubr.msk.bf16.mxu0 %vm2979_vm0, %v2978_v1  ;;  %2747 = vmatpush3.bf16.msra.mxu0 %v2810_v59 }
 0x6b2   :  { %v1702_v63 = vpack.c.b16 %v1701_v50, %v1701_v50  ;;  %2748 = vmatprep.subr.bf16.mxu0 %v2978_v1 }
 0x6b4   :  { %2743 = vmatmul.mubr.msk.bf16.vlgmr.msra.gmra.mrb[32].mxu1 %vm937_vm13, %v1702_v63 }
 0x6b5   :  { %2755 = vmatpush3.bf16.msra.mxu1 %v2808_v32  ;;  %2758 = vmatprep.mubr.msk.bf16.mxu1 %vm2979_vm0, %v2978_v1  ;;  %vm2490_vm0 = vcmask 195584  }
 0x6b6   :  { %2756 = vmatprep.subr.bf16.mxu1 %v2978_v1  ;;  %2749 = vmatpush3.bf16.msra.mxu0 %v2811_v62 }
 0x6b7   :  { %2762 = vmatprep.subr.bf16.mxu0 %v3558_v39 }
 0x6b9   :  { %2757 = vmatpush3.bf16.msra.mxu1 %v2809_v3 }
 0x6bc   :  { %2759 = vmatmul.mubr.msk.bf16.vlgmr.msra.gmra.mrb[36].mxu1 %vm135_vm2, %v3169_v15 }
 0x757   :  { %v1300_v15 = vpop.f32.mrb[4].mxu0 }
 0x758   :  { %v2702_v31 = vpop.f32.mrb[5].mxu0  ;;  %v1747_v11 = vpack.c.bf16 %v1300_v15, %v1300_v15 }
 0x759   :  { %v1303_v23 = vpop.f32.mrb[6].mxu0 }
 0x75a   :  { %v2703_v7 = vpop.f32.mrb[7].mxu0  ;;  %v1779_v44 = vunpack.c.l.b16 %v1747_v11 }
 0x75f   :  { %v1363_v57 = vpop.f32.mrb[8].mxu0 }
 0x760   :  { %v1748_v19 = vpack.c.bf16 %v1363_v57, %v1363_v57  ;;  %v2503_v25 = vrot.slane %v1363_v57, 7  ;;  %v2708_v9 = vpop.f32.mrb[9].mxu0 }
 0x761   :  { %v1366_v30 = vpop.f32.mrb[10].mxu0 }
 0x762   :  { %v1780_v43 = vunpack.c.l.b16 %v1748_v19  ;;  %v2504_v1 = vsel %vm922_vm6, %v2503_v25, %v1300_v15  ;;  %v2709_v6 = vpop.f32.mrb[11].mxu0 }
 0x764   :  { %v1787_v45 = vrot.slane %v1780_v43, 7 }
 0x766   :  { %v1788_v4 = vsel %vm922_vm6, %v1787_v45, %v1779_v44 }
 0x767   :  { %v1426_v58 = vpop.f32.mrb[12].mxu0 }
 0x768   :  { %v1749_v51 = vpack.c.bf16 %v1426_v58, %v1426_v58  ;;  %v2505_v49 = vrot.slane %v1426_v58, 6  ;;  %v2714_v18 = vpop.f32.mrb[13].mxu0 }
 0x769   :  { %v1429_v2 = vpop.f32.mrb[14].mxu0 }
 0x76a   :  { %v1781_v55 = vunpack.c.l.b16 %v1749_v51  ;;  %v2506_v20 = vsel %vm924_vm7, %v2505_v49, %v2504_v1  ;;  %v2715_v54 = vpop.f32.mrb[15].mxu0 }
 0x76c   :  { %v1789_v36 = vrot.slane %v1781_v55, 6  ;;  %v2814_v55 = vld [vmem:[%s3760_s2] sm:$0xff]  }
 0x76e   :  { %v1790_v40 = vsel %vm924_vm7, %v1789_v36, %v1788_v4  ;;  %v2813_v36 = vld [vmem:[%s3763_s5 + $0x28] sm:$0xff]  }
 0x76f   :  { %v1489_v41 = vpop.f32.mrb[24].mxu1 }
 0x770   :  { %v1750_v0 = vpack.c.bf16 %v1489_v41, %v1489_v41  ;;  %v2507_v61 = vrot.slane %v1489_v41, 5  ;;  %v2720_v21 = vpop.f32.mrb[25].mxu1 }
 0x771   :  { %v1492_v8 = vpop.f32.mrb[26].mxu1  ;;  %v2816_v21 = vld [vmem:[%s3760_s2 + $0x10] sm:$0xff]  }
 0x772   :  { %v1782_v13 = vunpack.c.l.b16 %v1750_v0  ;;  %v2508_v22 = vsel %vm926_vm8, %v2507_v61, %v2506_v20  ;;  %v2721_v14 = vpop.f32.mrb[27].mxu1  ;;  %v2815_v61 = vld [vmem:[%s3760_s2 + $0x8] sm:$0xff]   ;;  %v2818_v8 = vld [vmem:[%s3760_s2 + $0x20] sm:$0xff]  }
 0x773   :  { %v1552_v16 = vpop.f32.mrb[16].mxu0  ;;  %v2821_v14 = vld [vmem:[%s3760_s2 + $0x38] sm:$0xff]  }
 0x774   :  { %v1791_v53 = vrot.slane %v1782_v13, 5  ;;  %v1751_v46 = vpack.c.bf16 %v1552_v16, %v1552_v16  ;;  %v2509_v29 = vrot.slane %v1552_v16, 4  ;;  %v2726_v27 = vpop.f32.mrb[17].mxu0  ;;  %v2819_v13 = vld [vmem:[%s3760_s2 + $0x28] sm:$0xff]   ;;  %v1769_v16 = vld [vmem:[%s3763_s5 + $0x34] sm:$0x1] }
 0x775   :  { %v1555_v42 = vpop.f32.mrb[18].mxu0 }
 0x776   :  { %v1792_v33 = vsel %vm926_vm8, %v1791_v53, %v1790_v40  ;;  %v1783_v47 = vunpack.c.l.b16 %v1751_v46  ;;  %v2510_v56 = vsel %vm928_vm9, %v2509_v29, %v2508_v22  ;;  %v2727_v34 = vpop.f32.mrb[19].mxu0  ;;  %v2820_v22 = vld [vmem:[%s3760_s2 + $0x30] sm:$0xff]   ;;  %v1770_v53 = vunpack.c.l.bf16 %v1769_v16 }
 0x777   :  { %v1767_v34 = vld [vmem:[%s3763_s5 + $0x30] sm:$0xf] }
 0x778   :  { %v1793_v10 = vrot.slane %v1783_v47, 4  ;;  %v1912_v46 = vrot.slane %v1770_v53, %v3065_v17 }
 0x77a   :  { %v1794_v48 = vsel %vm928_vm9, %v1793_v10, %v1792_v33 }
 0x77b   :  { %v1615_v52 = vpop.f32.mrb[28].mxu1 }
 0x77c   :  { %v1752_v5 = vpack.c.bf16 %v1615_v52, %v1615_v52  ;;  %v2511_v38 = vrot.slane %v1615_v52, 3  ;;  %v2732_v60 = vpop.f32.mrb[29].mxu1 }
 0x77d   :  { %v1618_v50 = vpop.f32.mrb[30].mxu1  ;;  %v3623_v60 = vunpack.c.l.bf16 %v1767_v34 }
 0x77e   :  { %v1784_v32 = vunpack.c.l.b16 %v1752_v5  ;;  %v2512_v63 = vsel %vm930_vm10, %v2511_v38, %v2510_v56  ;;  %v2733_v3 = vpop.f32.mrb[31].mxu1 }
 0x780   :  { %v1795_v59 = vrot.slane %v1784_v32, 3 }
 0x782   :  { %v1796_v62 = vsel %vm930_vm10, %v1795_v59, %v1794_v48 }
 0x783   :  { %v1678_v15 = vpop.f32.mrb[20].mxu0 }
 0x784   :  { %v1753_v31 = vpack.c.bf16 %v1678_v15, %v1678_v15  ;;  %v2513_v23 = vrot.slane %v1678_v15, 2  ;;  %v2738_v7 = vpop.f32.mrb[21].mxu0 }
 0x785   :  { %v1681_v57 = vpop.f32.mrb[22].mxu0 }
 0x786   :  { %v1785_v11 = vunpack.c.l.b16 %v1753_v31  ;;  %v2514_v19 = vsel %vm932_vm11, %v2513_v23, %v2512_v63  ;;  %v2739_v25 = vpop.f32.mrb[23].mxu0 }
 0x787   :  { %v1741_v9 = vpop.f32.mrb[32].mxu1 }
 0x788   :  { %v1797_v30 = vrot.slane %v1785_v11, 2  ;;  %v1754_v43 = vpack.c.bf16 %v1741_v9, %v1741_v9  ;;  %v2515_v1 = vrot.slane %v1741_v9, 1  ;;  %v2744_v6 = vpop.f32.mrb[33].mxu1 }
 0x789   :  { %v1744_v44 = vpop.f32.mrb[34].mxu1 }
 0x78a   :  { %v1798_v45 = vsel %vm932_vm11, %v1797_v30, %v1796_v62  ;;  %v1786_v4 = vunpack.c.l.b16 %v1754_v43  ;;  %v2516_v58 = vsel %vm934_vm12, %v2515_v1, %v2514_v19  ;;  %v2745_v51 = vpop.f32.mrb[35].mxu1 }
 0x78b   :  { %v2518_v49 = vsel %vm135_vm2, %v2516_v58, 0.0 }
 0x78c   :  { %v1799_v18 = vrot.slane %v1786_v4, 1  ;;  %2519 = vst [vmem:[#allocation2 + $0x10] sm:$0xff] %v2518_v49 }
 0x78e   :  { %v1800_v2 = vsel %vm934_vm12, %v1799_v18, %v1798_v45 }
 0x78f   :  { %v1801_v20 = vpack.c.b16 %v1800_v2, %v1800_v2  ;;  %v1903_v54 = vpop.f32.mrb[36].mxu1 }
 0x790   :  { %v2760_v40 = vpop.f32.mrb[37].mxu1 }
 0x791   :  { %2751 = vmatmul.mubr.msk.bf16.vlgmr.msra.gmra.mrb[24].mxu0 %vm135_vm2, %v1801_v20  ;;  %v1906_v41 = vpop.f32.mrb[38].mxu1 }
 0x792   :  { %v2761_v0 = vpop.f32.mrb[39].mxu1  ;;  %2763 = vmatpush3.bf16.msra.mxu0 %v3558_v39  ;;  %2766 = vmatprep.mubr.msk.bf16.mxu0 %vm135_vm2, %v2814_v55  ;;  %v2817_v39 = vld [vmem:[%s3760_s2 + $0x18] sm:$0xff]  }
 0x793   :  { %2764 = vmatprep.subr.bf16.mxu0 %v2813_v36 }
 0x796   :  { %2765 = vmatpush3.bf16.msra.mxu0 %v2813_v36  ;;  %v3644_v36 = vrot.slane %v1770_v53, %v3104_v35 }
 0x799   :  { %2767 = vmatmul.mubr.msk.bf16.vlgmr.msra.gmra.mrb[28].mxu0 %vm135_vm2, %v2815_v61 }
 0x79a   :  { %2770 = vmatprep.mubr.msk.bf16.mxu0 %vm135_vm2, %v2816_v21 }
 0x7a1   :  { %2771 = vmatmul.mubr.msk.bf16.gmra.mrb[32].mxu0 %vm135_vm2, %v2817_v39 }
 0x7a2   :  { %2774 = vmatprep.mubr.msk.bf16.mxu0 %vm135_vm2, %v2818_v8 }
 0x7a9   :  { %2775 = vmatmul.mubr.msk.bf16.gmra.mrb[36].mxu0 %vm135_vm2, %v2819_v13 }
 0x7aa   :  { %2778 = vmatprep.mubr.msk.bf16.mxu0 %vm135_vm2, %v2820_v22 }
 0x7b1   :  { %2779 = vmatmul.mubr.msk.bf16.gmra.mrb[40].mxu0 %vm135_vm2, %v2821_v14 }
 0x864   :  { %v1851_v29 = vpop.f32.mrb[24].mxu0 }
 0x865   :  { %v1904_v27 = vadd.f32 %v1903_v54, %v1851_v29  ;;  %v2752_v42 = vpop.f32.mrb[25].mxu0 }
 0x866   :  { %v1854_v33 = vpop.f32.mrb[26].mxu0 }
 0x867   :  { %v1913_v47 = vadd.f32 %v1912_v46, %v1904_v27  ;;  %v2753_v56 = vpop.f32.mrb[27].mxu0 }
 0x869   :  { %v2104_v10 = vcombine.high %v1913_v47, %v1913_v47  ;;  %v2111_v48 = vrot.slane %v1913_v47, %v3183_v37 }
 0x86b   :  { %v2118_v52 = vrot.slane %v2104_v10, %v3183_v37  ;;  %v2119_v5 = vcombine.high %v2111_v48, %v2111_v48  ;;  %v2127_v38 = vrot.slane %v2111_v48, %v3183_v37 }
 0x86c   :  { %v2768_v50 = vpop.f32.mrb[28].mxu0 }
 0x86d   :  { %v2120_v32 = vcombine.high %v2118_v52, %v2118_v52  ;;  %v2141_v63 = vrot.slane %v2119_v5, %v3183_v37  ;;  %v2040_v3 = vpop.f32.mrb[29].mxu0  ;;  %v2156_v59 = vrot.slane %v2127_v38, %v3065_v17  ;;  %v2149_v15 = vcombine.high %v2127_v38, %v2127_v38 }
 0x86e   :  { %v2769_v62 = vpop.f32.mrb[30].mxu0  ;;  %v2134_v44 = vrot.slane %v2118_v52, %v3183_v37 }
 0x86f   :  { %v2160_v31 = vrot.slane %v2141_v63, %v3065_v17  ;;  %v2193_v23 = vadd.f32 %v2156_v59, %v3623_v60  ;;  %v2245_v7 = vadd.f32 %v2156_v59, %v2040_v3  ;;  %v2043_v57 = vpop.f32.mrb[31].mxu0  ;;  %v2151_v11 = vcombine.high %v2141_v63, %v2141_v63 }
 0x870   :  { %v2246_v19 = vadd.f32 %v2156_v59, %v2043_v57  ;;  %v3630_v25 = vrot.slane %v2120_v32, %v3183_v37  ;;  %v2164_v6 = vrot.slane %v2149_v15, %v3065_v17  ;;  %v2172_v20 = vrot.slane %v2134_v44, %v3065_v17 }
 0x871   :  { %v2194_v9 = vadd.f32 %v2160_v31, %v3623_v60  ;;  %v2247_v30 = vadd.f32 %v2768_v50, %v2160_v31  ;;  %2900 = vtanh.f32 %v2193_v23  ;;  %v2248_v43 = vadd.f32 %v2769_v62, %v2160_v31 }
 0x872   :  { %2902 = vtanh.f32 %v2245_v7  ;;  %v2168_v1 = vrot.slane %v2151_v11, %v3065_v17  ;;  %v2176_v49 = vrot.slane %v3630_v25, %v3065_v17  ;;  %v2195_v18 = vadd.f32 %v2164_v6, %v3623_v60 }
 0x873   :  { %2904 = vtanh.f32 %v2194_v9  ;;  %v2150_v41 = vcombine.high %v2134_v44, %v2134_v44  ;;  %v2197_v61 = vadd.f32 %v2172_v20, %v3623_v60  ;;  %v2152_v10 = vcombine.high %v3630_v25, %v3630_v25 }
 0x874   :  { %2906 = vtanh.f32 %v2247_v30  ;;  %v2772_v45 = vpop.f32.mrb[32].mxu0  ;;  %v2196_v4 = vadd.f32 %v2168_v1, %v3623_v60  ;;  %v2198_v0 = vadd.f32 %v2176_v49, %v3623_v60 }
 0x875   :  { %2908 = vtanh.f32 %v2248_v43  ;;  %v2251_v58 = vadd.f32 %v2772_v45, %v2168_v1  ;;  %v2056_v51 = vpop.f32.mrb[33].mxu0  ;;  %v2180_v22 = vrot.slane %v2150_v41, %v3065_v17  ;;  %v2184_v62 = vrot.slane %v2152_v10, %v3065_v17 }
 0x876   :  { %2910 = vtanh.f32 %v2246_v19  ;;  %v2249_v2 = vadd.f32 %v2164_v6, %v2056_v51  ;;  %v2773_v55 = vpop.f32.mrb[34].mxu0 }
 0x877   :  { %v3641_v54 = vadd.f32 %v2773_v55, %v2168_v1  ;;  %v2059_v37 = vpop.f32.mrb[35].mxu0  ;;  %2912 = vtanh.f32 %v2196_v4  ;;  %v2199_v38 = vadd.f32 %v2180_v22, %v3623_v60 }
 0x878   :  { %v2250_v40 = vadd.f32 %v2164_v6, %v2059_v37  ;;  %2914 = vtanh.f32 %v2195_v18 }
 0x879   :  { %2916 = vtanh.f32 %v2198_v0 }
 0x87a   :  { %2918 = vtanh.f32 %v2197_v61 }
 0x87b   :  { %v2901_v21 = vpop.eup %2900  ;;  %2920 = vtanh.f32 %v2251_v58 }
 0x87c   :  { %v2903_v39 = vpop.eup %2902  ;;  %v2776_v8 = vpop.f32.mrb[36].mxu0  ;;  %v2213_v13 = vmul.f32 %v2901_v21, %v3644_v36  ;;  %2922 = vtanh.f32 %v2199_v38 }
 0x87d   :  { %v2905_v14 = vpop.eup %2904  ;;  %v2255_v16 = vadd.f32 %v2776_v8, %v2176_v49  ;;  %v2072_v35 = vpop.f32.mrb[37].mxu0  ;;  %v2277_v53 = vmul.f32 %v2903_v39, %v3644_v36  ;;  %2924 = vtanh.f32 %v2249_v2 }
 0x87e   :  { %v2907_v46 = vpop.eup %2906  ;;  %v2253_v29 = vadd.f32 %v2172_v20, %v2072_v35  ;;  %v2777_v27 = vpop.f32.mrb[38].mxu0  ;;  %v2221_v42 = vsel %vm135_vm2, %v2213_v13, 0.0  ;;  %v2214_v32 = vmul.f32 %v2905_v14, %v3644_v36  ;;  %2926 = vtanh.f32 %v2250_v40 }
 0x87f   :  { %v2909_v33 = vpop.eup %2908  ;;  %v2256_v47 = vadd.f32 %v2777_v27, %v2176_v49  ;;  %v2075_v56 = vpop.f32.mrb[39].mxu0  ;;  %v2293_v34 = vsel %vm135_vm2, %v2277_v53, 0.0  ;;  %2222 = vadd.xlane.f32.xlu0 %v2221_v42  ;;  %v2279_v15 = vmul.f32 %v2907_v46, %v3644_v36  ;;  %2928 = vtanh.f32 %v3641_v54 }
 0x880   :  { %v2911_v48 = vpop.eup %2910  ;;  %v2254_v52 = vadd.f32 %v2172_v20, %v2075_v56  ;;  %2294 = vadd.xlane.f32.xlu1 %v2293_v34  ;;  %v2280_v5 = vmul.f32 %v2909_v33, %v3644_v36  ;;  %v2224_v25 = vsel %vm135_vm2, %v2214_v32, 0.0  ;;  %2930 = vtanh.f32 %v2255_v16 }
 0x881   :  { %v2278_v50 = vmul.f32 %v2911_v48, %v3644_v36  ;;  %v2913_v63 = vpop.eup %2912  ;;  %v2299_v17 = vsel %vm135_vm2, %v2279_v15, 0.0  ;;  %2932 = vtanh.f32 %v2253_v29 }
 0x882   :  { %v2302_v59 = vsel %vm135_vm2, %v2280_v5, 0.0  ;;  %v2915_v31 = vpop.eup %2914  ;;  %v2216_v6 = vmul.f32 %v2913_v63, %v3644_v36  ;;  %2934 = vtanh.f32 %v2254_v52 }
 0x883   :  { %v2296_v3 = vsel %vm135_vm2, %v2278_v50, 0.0  ;;  %v2917_v9 = vpop.eup %2916  ;;  %v2215_v1 = vmul.f32 %v2915_v31, %v3644_v36  ;;  %2936 = vtanh.f32 %v2256_v47 }
 0x884   :  { %2297 = vadd.xlane.f32.xlu0 %v2296_v3  ;;  %2303 = vadd.xlane.f32.xlu1 %v2302_v59  ;;  %v2780_v23 = vpop.f32.mrb[40].mxu0  ;;  %v2919_v44 = vpop.eup %2918  ;;  %v2230_v58 = vsel %vm135_vm2, %v2216_v6, 0.0  ;;  %v2218_v49 = vmul.f32 %v2917_v9, %v3644_v36 }
 0x885   :  { %v2259_v7 = vadd.f32 %v2780_v23, %v2184_v62  ;;  %v2088_v57 = vpop.f32.mrb[41].mxu0  ;;  %v2227_v4 = vsel %vm135_vm2, %v2215_v1, 0.0  ;;  %v2217_v51 = vmul.f32 %v2919_v44, %v3644_v36  ;;  %v2921_v18 = vpop.eup %2920 }
 0x886   :  { %v2257_v11 = vadd.f32 %v2180_v22, %v2088_v57  ;;  %v2781_v19 = vpop.f32.mrb[42].mxu0  ;;  %v2923_v2 = vpop.eup %2922  ;;  %v2236_v54 = vsel %vm135_vm2, %v2218_v49, 0.0  ;;  %v2283_v40 = vmul.f32 %v2921_v18, %v3644_v36  ;;  %v2409_v49 = vadd.s32 4294967280, %v3293_v24 }
 0x887   :  { %v2260_v30 = vadd.f32 %v2781_v19, %v2184_v62  ;;  %v2091_v43 = vpop.f32.mrb[43].mxu0  ;;  %v2925_v55 = vpop.eup %2924  ;;  %v2233_v20 = vsel %vm135_vm2, %v2217_v51, 0.0  ;;  %v2219_v37 = vmul.f32 %v2923_v2, %v3644_v36  ;;  %2938 = vtanh.f32 %v2259_v7 }
 0x888   :  { %v2258_v45 = vadd.f32 %v2180_v22, %v2091_v43  ;;  %2300 = vadd.xlane.f32.xlu0 %v2299_v17  ;;  %2225 = vadd.xlane.f32.xlu1 %v2224_v25  ;;  %v2927_v41 = vpop.eup %2926  ;;  %v2311_v21 = vsel %vm135_vm2, %v2283_v40, 0.0  ;;  %v2281_v39 = vmul.f32 %v2925_v55, %v3644_v36  ;;  %v2200_v22 = vadd.f32 %v2184_v62, %v3623_v60 }
 0x889   :  { %v2929_v0 = vpop.eup %2928  ;;  %v2239_v61 = vsel %vm135_vm2, %v2219_v37, 0.0  ;;  %v2282_v8 = vmul.f32 %v2927_v41, %v3644_v36  ;;  %2940 = vtanh.f32 %v2257_v11  ;;  %v2412_v55 = vsub.s32 %v2409_v49, %v3059_v12 }
 0x88a   :  { %v2931_v13 = vpop.eup %2930  ;;  %2942 = vtanh.f32 %v2258_v45  ;;  %v2305_v16 = vsel %vm135_vm2, %v2281_v39, 0.0  ;;  %v2284_v53 = vmul.f32 %v2929_v0, %v3644_v36 }
 0x88b   :  { %v2933_v14 = vpop.eup %2932  ;;  %v2308_v35 = vsel %vm135_vm2, %v2282_v8, 0.0  ;;  %v2287_v46 = vmul.f32 %v2931_v13, %v3644_v36  ;;  %2944 = vtanh.f32 %v2200_v22 }
 0x88c   :  { %2228 = vadd.xlane.f32.xlu0 %v2227_v4  ;;  %2231 = vadd.xlane.f32.xlu1 %v2230_v58  ;;  %v2935_v29 = vpop.eup %2934  ;;  %2946 = vtanh.f32 %v2260_v30  ;;  %v2314_v42 = vsel %vm135_vm2, %v2284_v53, 0.0  ;;  %v2285_v33 = vmul.f32 %v2933_v14, %v3644_v36 }
 0x88d   :  { %v2937_v27 = vpop.eup %2936  ;;  %v2323_v60 = vsel %vm135_vm2, %v2287_v46, 0.0  ;;  %v2286_v47 = vmul.f32 %v2935_v29, %v3644_v36 }
 0x88e   :  { %v2317_v10 = vsel %vm135_vm2, %v2285_v33, 0.0  ;;  %v2288_v52 = vmul.f32 %v2937_v27, %v3644_v36 }
 0x88f   :  { %v2320_v48 = vsel %vm135_vm2, %v2286_v47, 0.0 }
 0x890   :  { %2234 = vadd.xlane.f32.xlu0 %v2233_v20  ;;  %2237 = vadd.xlane.f32.xlu1 %v2236_v54  ;;  %v2326_v32 = vsel %vm135_vm2, %v2288_v52, 0.0 }
 0x891   :  { %v2939_v56 = vpop.eup %2938 }
 0x892   :  { %v2291_v5 = vmul.f32 %v2939_v56, %v3644_v36 }
 0x893   :  { %v2941_v34 = vpop.eup %2940 }
 0x894   :  { %2240 = vadd.xlane.f32.xlu0 %v2239_v61  ;;  %2312 = vadd.xlane.f32.xlu1 %v2311_v21  ;;  %v2943_v38 = vpop.eup %2942  ;;  %v2335_v63 = vsel %vm135_vm2, %v2291_v5, 0.0  ;;  %v2289_v3 = vmul.f32 %v2941_v34, %v3644_v36 }
 0x895   :  { %v2945_v50 = vpop.eup %2944  ;;  %v2290_v59 = vmul.f32 %v2943_v38, %v3644_v36 }
 0x896   :  { %v2947_v62 = vpop.eup %2946  ;;  %v2329_v15 = vsel %vm135_vm2, %v2289_v3, 0.0  ;;  %v2220_v7 = vmul.f32 %v2945_v50, %v3644_v36 }
 0x897   :  { %v2332_v31 = vsel %vm135_vm2, %v2290_v59, 0.0  ;;  %v2292_v23 = vmul.f32 %v2947_v62, %v3644_v36 }
 0x898   :  { %2306 = vadd.xlane.f32.xlu0 %v2305_v16  ;;  %2309 = vadd.xlane.f32.xlu1 %v2308_v35  ;;  %v2242_v11 = vsel %vm135_vm2, %v2220_v7, 0.0 }
 0x899   :  { %v2338_v57 = vsel %vm135_vm2, %v2292_v23, 0.0 }
 0x89c   :  { %2315 = vadd.xlane.f32.xlu0 %v2314_v42  ;;  %2324 = vadd.xlane.f32.xlu1 %v2323_v60 }
 0x8a0   :  { %2318 = vadd.xlane.f32.xlu0 %v2317_v10  ;;  %2321 = vadd.xlane.f32.xlu1 %v2320_v48 }
 0x8a4   :  { %2327 = vadd.xlane.f32.xlu0 %v2326_v32  ;;  %2336 = vadd.xlane.f32.xlu1 %v2335_v63 }
 0x8a8   :  { %2330 = vadd.xlane.f32.xlu0 %v2329_v15  ;;  %2333 = vadd.xlane.f32.xlu1 %v2332_v31 }
 0x8ac   :  { %2339 = vadd.xlane.f32.xlu0 %v2338_v57  ;;  %2243 = vadd.xlane.f32.xlu1 %v2242_v11 }
 0x90c   :  { %v2223_v19 = vpop.xlane.xlu0 %2222 }
 0x90d   :  { %v2295_v25 = vpop.xlane.xlu1 %2294  ;;  %v2352_v41 = vrot.slane %v2223_v19, %v3298_v26 }
 0x90e   :  { %v2408_v53 = vrot.slane %v2295_v25, %v3301_v28 }
 0x911   :  { %v2298_v9 = vpop.xlane.xlu0 %2297  ;;  %v2304_v30 = vpop.xlane.xlu1 %2303 }
 0x912   :  { %v2413_v0 = vrot.slane %v2298_v9, %v2412_v55  ;;  %v2423_v16 = vrot.slane %v2304_v30, %v2412_v55 }
 0x914   :  { %v2415_v47 = vsel %vm2414_vm14, %v2413_v0, %v2408_v53 }
 0x915   :  { %v2301_v43 = vpop.xlane.xlu0 %2300  ;;  %v2226_v17 = vpop.xlane.xlu1 %2225 }
 0x916   :  { %v2356_v20 = vrot.slane %v2226_v17, %v3298_v26  ;;  %v2419_v61 = vrot.slane %v2301_v43, %v3301_v28 }
 0x918   :  { %v2381_v21 = vsel %vm922_vm6, %v2356_v20, %v2352_v41  ;;  %v2424_v27 = vsel %vm2414_vm14, %v2423_v16, %v2419_v61 }
 0x919   :  { %v2229_v1 = vpop.xlane.xlu0 %2228  ;;  %v2232_v6 = vpop.xlane.xlu1 %2231  ;;  %v2479_v63 = vsel %vm922_vm6, %v2424_v27, %v2415_v47 }
 0x91a   :  { %v2360_v54 = vrot.slane %v2229_v1, %v3298_v26  ;;  %v2364_v39 = vrot.slane %v2232_v6, %v3298_v26 }
 0x91c   :  { %v2382_v24 = vsel %vm924_vm7, %v2360_v54, %v2381_v21 }
 0x91d   :  { %v2235_v44 = vpop.xlane.xlu0 %2234  ;;  %v2238_v45 = vpop.xlane.xlu1 %2237  ;;  %v2383_v42 = vsel %vm926_vm8, %v2364_v39, %v2382_v24 }
 0x91e   :  { %v2368_v8 = vrot.slane %v2235_v44, %v3298_v26  ;;  %v2372_v34 = vrot.slane %v2238_v45, %v3298_v26  ;;  %v28_v45 = vld [vmem:[%s3758_s0 + $0x18] sm:$0xff] }
 0x920   :  { %v2384_v56 = vsel %vm928_vm9, %v2368_v8, %v2383_v42 }
 0x921   :  { %v2241_v4 = vpop.xlane.xlu0 %2240  ;;  %v2313_v36 = vpop.xlane.xlu1 %2312  ;;  %v2385_v31 = vsel %vm930_vm10, %v2372_v34, %v2384_v56 }
 0x922   :  { %v2437_v60 = vrot.slane %v2313_v36, %v3301_v28  ;;  %v2376_v3 = vrot.slane %v2241_v4, %v3298_v26 }
 0x924   :  { %v2386_v43 = vsel %vm932_vm11, %v2376_v3, %v2385_v31 }
 0x925   :  { %v2307_v58 = vpop.xlane.xlu0 %2306  ;;  %v2310_v51 = vpop.xlane.xlu1 %2309 }
 0x926   :  { %v2428_v12 = vrot.slane %v2307_v58, %v3301_v28  ;;  %v2432_v13 = vrot.slane %v2310_v51, %v2412_v55 }
 0x928   :  { %v2433_v10 = vsel %vm2414_vm14, %v2432_v13, %v2428_v12 }
 0x929   :  { %v2316_v18 = vpop.xlane.xlu0 %2315  ;;  %v2325_v2 = vpop.xlane.xlu1 %2324  ;;  %v2480_v62 = vsel %vm924_vm7, %v2433_v10, %v2479_v63 }
 0x92a   :  { %v2441_v35 = vrot.slane %v2316_v18, %v2412_v55  ;;  %v2455_v38 = vrot.slane %v2325_v2, %v3301_v28 }
 0x92c   :  { %v2442_v5 = vsel %vm2414_vm14, %v2441_v35, %v2437_v60 }
 0x92d   :  { %v2319_v37 = vpop.xlane.xlu0 %2318  ;;  %v2322_v40 = vpop.xlane.xlu1 %2321  ;;  %v2481_v23 = vsel %vm926_vm8, %v2442_v5, %v2480_v62 }
 0x92e   :  { %v2446_v46 = vrot.slane %v2319_v37, %v3301_v28  ;;  %v2450_v29 = vrot.slane %v2322_v40, %v2412_v55 }
 0x930   :  { %v2451_v59 = vsel %vm2414_vm14, %v2450_v29, %v2446_v46 }
 0x931   :  { %v2328_v22 = vpop.xlane.xlu0 %2327  ;;  %v2337_v14 = vpop.xlane.xlu1 %2336  ;;  %v2482_v19 = vsel %vm928_vm9, %v2451_v59, %v2481_v23 }
 0x932   :  { %v2459_v33 = vrot.slane %v2328_v22, %v2412_v55  ;;  %v2473_v25 = vrot.slane %v2337_v14, %v3301_v28 }
 0x934   :  { %v2460_v15 = vsel %vm2414_vm14, %v2459_v33, %v2455_v38 }
 0x935   :  { %v2331_v48 = vpop.xlane.xlu0 %2330  ;;  %v2334_v52 = vpop.xlane.xlu1 %2333  ;;  %v2483_v17 = vsel %vm930_vm10, %v2460_v15, %v2482_v19 }
 0x936   :  { %v2464_v50 = vrot.slane %v2331_v48, %v3301_v28  ;;  %v2468_v32 = vrot.slane %v2334_v52, %v2412_v55 }
 0x938   :  { %v2469_v7 = vsel %vm2414_vm14, %v2468_v32, %v2464_v50 }
 0x939   :  { %v2340_v57 = vpop.xlane.xlu0 %2339  ;;  %v2244_v11 = vpop.xlane.xlu1 %2243  ;;  %v2484_v1 = vsel %vm932_vm11, %v2469_v7, %v2483_v17 }
 0x93a   :  { %v2477_v9 = vrot.slane %v2340_v57, %v2412_v55  ;;  %v2380_v30 = vrot.slane %v2244_v11, %v3298_v26 }
 0x93c   :  { %v2478_v6 = vsel %vm2414_vm14, %v2477_v9, %v2473_v25  ;;  %v2387_v44 = vsel %vm934_vm12, %v2380_v30, %v2386_v43 }
 0x93d   :  { %v2485_v28 = vsel %vm934_vm12, %v2478_v6, %v2484_v1 }
 0x93e   :  { %v2488_v26 = vsel %vm2487_vm15, %v2387_v44, %v2485_v28 }
 0x93f   :  { %v2489_v4 = vadd.f32 %v2488_v26, %v28_v45 }
 0x941   :  { %v2491_v36 = vsel %vm2490_vm0, %v2489_v4, 0.0 }
 0x942   :  { %2492 = vst [vmem:[#allocation2] sm:$0xff] %v2491_v36 }
 0x943   :  { %2965 = shalt.err (!%p2962_p4)
}
 0x944   :  { %s2966_s0 = scalar_lea.hbm %s3764_s6, 384 }
 0x945   :  { %p2967_p5 = scmp.ne.s32.totalorder %s3764_s6, %s2966_s0  ;;  %p2970_p6 = scmp.lt.u32.totalorder %s2966_s0, %s3764_s6 }
 0x947   :  { %p2972_p7 = pnand %p2970_p6, %p2967_p5 }
 0x949   :  { %2975 = shalt.err (!%p2972_p7)
}
 0x94a   :  { %2529 = dma.vmem_to_hbm [thread:$0]  %s2527_s13, 384, %s3764_s6, [#allocation3]  }
 0x94b   :  { %2976 = dma.done.wait [#allocation3], 384  }
 0x94c   :  { %2977 = vsyncadd [#allocation3], 4294966912 }
 0x94d   :  { %2533 = vsyncpa [#allocation3], 1 }

</bundles_post_ra>
